<compile_context>
chip_gen: v7x
topology: tpu7x:2x2x1
jax: 0.10.0
libtpu: 0.0.40
codegen_flags: <defaults>
</compile_context>

<pallas_src>
import jax
import jax.numpy as jnp
from jax import lax
from jax.experimental import pallas as pl
from jax.experimental.pallas import tpu as pltpu


_INV_2POW16 = 1.0 / 65536.0


def _two_uniforms(bits_i32):
    """Split one int32 random word per element into two uniform [0,1) thresholds.

    16-bit resolution per threshold (ample for Bernoulli sampling); both
    thresholds are strictly < 1.0, which preserves torch's sequential
    `h[h > r1] = 1; h[h <= r2] = 0` semantics (a value set to 1 can never be
    reset to 0).
    """
    lo = (bits_i32 & 0xFFFF).astype(jnp.float32) * _INV_2POW16
    hi = ((bits_i32 >> 16) & 0xFFFF).astype(jnp.float32) * _INV_2POW16
    return lo, hi


def rbm_kernel(v_ref, w_ref, hb_ref, vb_ref, rh_ref, rv_ref,
               v_out_ref, h_out_ref):
    v = v_ref[...]                                    # [TB, V] bf16
    w = w_ref[...]                                    # [H,  V] bf16 (resident)

    # ---- hidden half-step: h = sigmoid(v @ W.T + h_bias), then binarize ----
    # Contract the last dim of both operands so only ONE weight orientation
    # has to be kept resident / read from HBM.
    h_lin = lax.dot_general(v, w,
                            dimension_numbers=(((1,), (1,)), ((), ())),
                            preferred_element_type=jnp.float32) + hb_ref[...]
    h = jax.nn.sigmoid(h_lin)                         # f32 [TB, H]
    u1, u2 = _two_uniforms(rh_ref[...])
    h = jnp.where(h > u1, jnp.float32(1.0), h)        # h[h > rand1] = 1.0
    h = jnp.where(h <= u2, jnp.float32(0.0), h)       # h[h <= rand2] = 0.0
    h_out_ref[...] = h.astype(h_out_ref.dtype)

    # ---- visible half-step: v = sigmoid(h @ W + v_bias), then binarize -----
    v_lin = jnp.dot(h.astype(w.dtype), w,
                    preferred_element_type=jnp.float32) + vb_ref[...]
    v_new = jax.nn.sigmoid(v_lin)                     # f32 [TB, V]
    u3, u4 = _two_uniforms(rv_ref[...])
    v_new = jnp.where(v_new > u3, jnp.float32(1.0), v_new)
    v_new = jnp.where(v_new <= u4, jnp.float32(0.0), v_new)
    v_out_ref[...] = v_new.astype(v_out_ref.dtype)


def _pick_batch_tile(batch):
    """Return (tile_rows, padded_batch).

    Prefer >= 4 grid steps (pipelining + both v7x TensorCores), then >= 2,
    with tiles as large as possible (multiples of 256 suit the v6e/v7x MXU)
    and never below 16 rows (bf16 sublane packing). Ragged/tiny batches are
    padded instead of running misaligned tiles.
    """
    for min_steps in (4, 2, 1):
        for tb in (512, 256, 128, 64, 32, 16):
            if batch % tb == 0 and batch // tb >= min_steps:
                return tb, batch
    tb = max(16, min(128, ((batch + 1) // 2 + 15) // 16 * 16))
    bp = max(2 * tb, ((batch + tb - 1) // tb) * tb)
    return tb, bp


def rbm_forward(v, W, v_bias, h_bias, *, key=None, seed=0):
    """One RBM Gibbs half-step pair (matches torch RBM.forward) on TPU.

    Returns (v_new, h) in bf16 (values are mostly exactly 0.0 / 1.0)."""
    B, V = v.shape
    H, V2 = W.shape
    assert V == V2, "W must have shape [num_hidden, num_visible]"
    if key is None:
        key = jax.random.PRNGKey(seed)

    TB, Bp = _pick_batch_tile(B)

    v_in = v.astype(jnp.bfloat16)
    if Bp != B:
        v_in = jnp.pad(v_in, ((0, Bp - B), (0, 0)))

    w_bf = W.astype(jnp.bfloat16)                       # [H, V], single copy
    hb2 = h_bias.reshape(1, H).astype(jnp.float32)
    vb2 = v_bias.reshape(1, V).astype(jnp.float32)

    kh, kv = jax.random.split(key)
    # One 32-bit word per output element; kernel splits it into two thresholds.
    rh = lax.bitcast_convert_type(
        jax.random.bits(kh, shape=(Bp, H), dtype=jnp.uint32), jnp.int32)
    rv = lax.bitcast_convert_type(
        jax.random.bits(kv, shape=(Bp, V), dtype=jnp.uint32), jnp.int32)

    # Honest VMEM accounting of the resident set (weights are double-buffered
    # by the default pipeline even though they are DMA'd only once).
    weight_bytes = 2 * H * V * 2                        # W bf16, 2 buffers
    bias_bytes = 2 * (H + V) * 4 * 2                    # biases f32, 2 buffers
    tile_bytes = 2 * (TB * V * 2                        # v tile bf16
                      + TB * (H + V) * 4                # random words int32
                      + TB * (H + V) * 2)               # outputs bf16
    resident = weight_bytes + bias_bytes + tile_bytes
    if int(resident * 1.25) > (60 << 20):
        # TODO(synk): add a K-tiled (grid axis over V/H with accumulation)
        # fallback for RBMs whose resident working set exceeds v7x's 64 MiB.
        raise ValueError(
            f"resident working set ({resident} B) too large for the "
            f"resident-weight strategy on v7x (64 MiB VMEM)")
    vmem_limit = int(min(max(int(resident * 1.25) + (1 << 20), 4 << 20),
                         64 << 20))

    cost = pl.CostEstimate(
        flops=4 * Bp * V * H,                           # two batched matmuls
        transcendentals=Bp * (V + H),                   # sigmoids
        bytes_accessed=(Bp * V * 2 + H * V * 2 + (V + H) * 4
                        + Bp * (V + H) * 4              # random words in
                        + Bp * (V + H) * 2),            # bf16 outputs
    )

    v_out, h_out = pl.pallas_call(
        rbm_kernel,
        out_shape=(
            jax.ShapeDtypeStruct((Bp, V), jnp.bfloat16),
            jax.ShapeDtypeStruct((Bp, H), jnp.bfloat16),
        ),
        grid=(Bp // TB,),
        in_specs=[
            pl.BlockSpec((TB, V), lambda i: (i, 0)),    # v tile
            pl.BlockSpec((H, V), lambda i: (0, 0)),     # W (resident)
            pl.BlockSpec((1, H), lambda i: (0, 0)),     # h_bias
            pl.BlockSpec((1, V), lambda i: (0, 0)),     # v_bias
            pl.BlockSpec((TB, H), lambda i: (i, 0)),    # random words for h
            pl.BlockSpec((TB, V), lambda i: (i, 0)),    # random words for v
        ],
        out_specs=(
            pl.BlockSpec((TB, V), lambda i: (i, 0)),    # v_out tile
            pl.BlockSpec((TB, H), lambda i: (i, 0)),    # h_out tile
        ),
        compiler_params=pltpu.CompilerParams(
            # "parallel" lets the batch axis be sharded across TensorCores;
            # there is no cross-step state so this is safe.
            dimension_semantics=("parallel",),
            vmem_limit_bytes=vmem_limit,
        ),
        cost_estimate=cost,
    )(v_in, w_bf, hb2, vb2, rh, rv)

    if Bp != B:
        v_out = v_out[:B]
        h_out = h_out[:B]
    return v_out, h_out


if __name__ == "__main__":
    # Small, TPU-friendly shapes: last dims multiples of 128, batch of 512 so
    # the tiler picks TB=128 and the grid really has 4 steps (pipeline + both
    # v7x TensorCores exercised).
    B = 512
    NUM_VISIBLE = 256
    NUM_HIDDEN = 128

    root = jax.random.PRNGKey(0)
    k_w, k_vb, k_hb, k_v, k_rng = jax.random.split(root, 5)

    W = jax.random.normal(k_w, (NUM_HIDDEN, NUM_VISIBLE), dtype=jnp.float32)
    v_bias = jax.random.normal(k_vb, (NUM_VISIBLE,), dtype=jnp.float32)
    h_bias = jax.random.normal(k_hb, (NUM_HIDDEN,), dtype=jnp.float32)
    v_in = (jax.random.uniform(k_v, (B, NUM_VISIBLE)) > 0.5).astype(jnp.float32)

    v_out, h_out = rbm_forward(v_in, W, v_bias, h_bias, key=k_rng)
    jax.block_until_ready((v_out, h_out))

    assert v_out.shape == (B, NUM_VISIBLE) and h_out.shape == (B, NUM_HIDDEN)

    v_out_f = v_out.astype(jnp.float32)
    h_out_f = h_out.astype(jnp.float32)

    # Structural correctness: every output element must be 0.0, 1.0, or the
    # corresponding sigmoid activation computed along the same bf16-matmul /
    # f32-accumulate path the kernel uses (tolerance covers bf16 storage).
    w_bf = W.astype(jnp.bfloat16)
    h_sig = jax.nn.sigmoid(
        lax.dot_general(v_in.astype(jnp.bfloat16), w_bf,
                        dimension_numbers=(((1,), (1,)), ((), ())),
                        preferred_element_type=jnp.float32) + h_bias)
    v_sig = jax.nn.sigmoid(
        jnp.dot(h_out.astype(jnp.bfloat16), w_bf,
                preferred_element_type=jnp.float32) + v_bias)

    def _matches(out, sig, tol=2e-2):
        d = jnp.minimum(jnp.minimum(jnp.abs(out), jnp.abs(out - 1.0)),
                        jnp.abs(out - sig))
        return bool(jnp.all(d <= tol))

    assert _matches(h_out_f, h_sig), "h output not in {0, 1, sigmoid(...)}"
    assert _matches(v_out_f, v_sig), "v output not in {0, 1, sigmoid(...)}"

    # Loose statistical sanity check on the stochastic binarization.
    assert 0.02 < float(jnp.mean(h_out_f)) < 0.98
    assert 0.02 < float(jnp.mean(v_out_f)) < 0.98

    print("KERNEL_OK")
</pallas_src>

<mosaic_0001>
module attributes {stable_mosaic.version = 11 : i64} {
  func.func @rbm_kernel(%arg0: i32, %arg1: memref<128x256xbf16, #tpu.memory_space<vmem>>, %arg2: memref<128x256xbf16, #tpu.memory_space<vmem>>, %arg3: memref<1x128xf32, #tpu.memory_space<vmem>>, %arg4: memref<1x256xf32, #tpu.memory_space<vmem>>, %arg5: memref<128x128xi32, #tpu.memory_space<vmem>>, %arg6: memref<128x256xi32, #tpu.memory_space<vmem>>, %arg7: memref<128x256xbf16, #tpu.memory_space<vmem>>, %arg8: memref<128x128xbf16, #tpu.memory_space<vmem>>) attributes {dimension_semantics = [#tpu.dimension_semantics<parallel>], iteration_bounds = array<i64: 4>, scalar_prefetch = 0 : i64, scratch_operands = 0 : i64, tpu.core_type = #tpu.core_type<tc>, window_params = [{transform_indices = @transform_0, window_bounds = array<i64: 128, 256>}, {pipeline_mode = #tpu.pipeline_mode<synchronous>, transform_indices = @transform_1, window_bounds = array<i64: 128, 256>}, {pipeline_mode = #tpu.pipeline_mode<synchronous>, transform_indices = @transform_2, window_bounds = array<i64: 1, 128>}, {pipeline_mode = #tpu.pipeline_mode<synchronous>, transform_indices = @transform_3, window_bounds = array<i64: 1, 256>}, {transform_indices = @transform_4, window_bounds = array<i64: 128, 128>}, {transform_indices = @transform_5, window_bounds = array<i64: 128, 256>}, {transform_indices = @transform_6, window_bounds = array<i64: 128, 256>}, {transform_indices = @transform_7, window_bounds = array<i64: 128, 128>}]} {
    %c0 = arith.constant 0 : index
    %c0_0 = arith.constant 0 : index
    %0 = vector.load %arg1[%c0, %c0_0] : memref<128x256xbf16, #tpu.memory_space<vmem>>, vector<128x256xbf16>
    %c0_1 = arith.constant 0 : index
    %c0_2 = arith.constant 0 : index
    %1 = vector.load %arg2[%c0_1, %c0_2] : memref<128x256xbf16, #tpu.memory_space<vmem>>, vector<128x256xbf16>
    %cst = arith.constant dense<0.000000e+00> : vector<128x128xf32>
    %2 = tpu.matmul %0, %1, %cst {dimension_numbers = #tpu.dot_dimension_numbers<[1], [1], [0], [0], [0, 0, 1, 0], [], []>} : vector<128x256xbf16>, vector<128x256xbf16>, vector<128x128xf32> -> vector<128x128xf32>
    %c0_3 = arith.constant 0 : index
    %c0_4 = arith.constant 0 : index
    %3 = vector.load %arg3[%c0_3, %c0_4] : memref<1x128xf32, #tpu.memory_space<vmem>>, vector<1x128xf32>
    %4 = vector.broadcast %3 : vector<1x128xf32> to vector<128x128xf32>
    %5 = arith.addf %2, %4 : vector<128x128xf32>
    %6 = arith.negf %5 : vector<128x128xf32>
    %7 = math.exp %6 : vector<128x128xf32>
    %cst_5 = arith.constant 1.000000e+00 : f32
    %8 = vector.broadcast %cst_5 : f32 to vector<128x128xf32>
    %9 = arith.addf %8, %7 : vector<128x128xf32>
    %10 = arith.divf %8, %9 : vector<128x128xf32>
    %c0_6 = arith.constant 0 : index
    %c0_7 = arith.constant 0 : index
    %11 = vector.load %arg5[%c0_6, %c0_7] : memref<128x128xi32, #tpu.memory_space<vmem>>, vector<128x128xi32>
    %c65535_i32 = arith.constant 65535 : i32
    %12 = vector.broadcast %c65535_i32 : i32 to vector<128x128xi32>
    %13 = arith.andi %11, %12 : vector<128x128xi32>
    %14 = arith.sitofp %13 : vector<128x128xi32> to vector<128x128xf32>
    %cst_8 = arith.constant 1.52587891E-5 : f32
    %15 = vector.broadcast %cst_8 : f32 to vector<128x128xf32>
    %16 = arith.mulf %14, %15 : vector<128x128xf32>
    %c16_i32 = arith.constant 16 : i32
    %17 = vector.broadcast %c16_i32 : i32 to vector<128x128xi32>
    %18 = arith.shrsi %11, %17 : vector<128x128xi32>
    %c65535_i32_9 = arith.constant 65535 : i32
    %19 = vector.broadcast %c65535_i32_9 : i32 to vector<128x128xi32>
    %20 = arith.andi %18, %19 : vector<128x128xi32>
    %21 = arith.sitofp %20 : vector<128x128xi32> to vector<128x128xf32>
    %cst_10 = arith.constant 1.52587891E-5 : f32
    %22 = vector.broadcast %cst_10 : f32 to vector<128x128xf32>
    %23 = arith.mulf %21, %22 : vector<128x128xf32>
    %24 = arith.cmpf ogt, %10, %16 : vector<128x128xf32>
    %cst_11 = arith.constant 1.000000e+00 : f32
    %25 = vector.broadcast %cst_11 : f32 to vector<128x128xf32>
    %26 = arith.select %24, %25, %10 : vector<128x128xi1>, vector<128x128xf32>
    %27 = arith.cmpf ole, %26, %23 : vector<128x128xf32>
    %cst_12 = arith.constant 0.000000e+00 : f32
    %28 = vector.broadcast %cst_12 : f32 to vector<128x128xf32>
    %29 = arith.select %27, %28, %26 : vector<128x128xi1>, vector<128x128xf32>
    %30 = arith.truncf %29 : vector<128x128xf32> to vector<128x128xbf16>
    %c0_13 = arith.constant 0 : index
    %c0_14 = arith.constant 0 : index
    %31 = vector.load %arg8[%c0_13, %c0_14] : memref<128x128xbf16, #tpu.memory_space<vmem>>, vector<128x128xbf16>
    tpu.vector_store %arg8[%c0_13, %c0_14], %30 {strides = array<i32>} : memref<128x128xbf16, #tpu.memory_space<vmem>>, vector<128x128xbf16>,
    %32 = arith.truncf %29 : vector<128x128xf32> to vector<128x128xbf16>
    %cst_15 = arith.constant dense<0.000000e+00> : vector<128x256xf32>
    %33 = tpu.matmul %32, %1, %cst_15 {dimension_numbers = #tpu.dot_dimension_numbers<[1], [0], [0], [1], [0, 0, 1, 1], [], []>} : vector<128x128xbf16>, vector<128x256xbf16>, vector<128x256xf32> -> vector<128x256xf32>
    %c0_16 = arith.constant 0 : index
    %c0_17 = arith.constant 0 : index
    %34 = vector.load %arg4[%c0_16, %c0_17] : memref<1x256xf32, #tpu.memory_space<vmem>>, vector<1x256xf32>
    %35 = vector.broadcast %34 : vector<1x256xf32> to vector<128x256xf32>
    %36 = arith.addf %33, %35 : vector<128x256xf32>
    %37 = arith.negf %36 : vector<128x256xf32>
    %38 = math.exp %37 : vector<128x256xf32>
    %cst_18 = arith.constant 1.000000e+00 : f32
    %39 = vector.broadcast %cst_18 : f32 to vector<128x256xf32>
    %40 = arith.addf %39, %38 : vector<128x256xf32>
    %41 = arith.divf %39, %40 : vector<128x256xf32>
    %c0_19 = arith.constant 0 : index
    %c0_20 = arith.constant 0 : index
    %42 = vector.load %arg6[%c0_19, %c0_20] : memref<128x256xi32, #tpu.memory_space<vmem>>, vector<128x256xi32>
    %c65535_i32_21 = arith.constant 65535 : i32
    %43 = vector.broadcast %c65535_i32_21 : i32 to vector<128x256xi32>
    %44 = arith.andi %42, %43 : vector<128x256xi32>
    %45 = arith.sitofp %44 : vector<128x256xi32> to vector<128x256xf32>
    %cst_22 = arith.constant 1.52587891E-5 : f32
    %46 = vector.broadcast %cst_22 : f32 to vector<128x256xf32>
    %47 = arith.mulf %45, %46 : vector<128x256xf32>
    %c16_i32_23 = arith.constant 16 : i32
    %48 = vector.broadcast %c16_i32_23 : i32 to vector<128x256xi32>
    %49 = arith.shrsi %42, %48 : vector<128x256xi32>
    %c65535_i32_24 = arith.constant 65535 : i32
    %50 = vector.broadcast %c65535_i32_24 : i32 to vector<128x256xi32>
    %51 = arith.andi %49, %50 : vector<128x256xi32>
    %52 = arith.sitofp %51 : vector<128x256xi32> to vector<128x256xf32>
    %cst_25 = arith.constant 1.52587891E-5 : f32
    %53 = vector.broadcast %cst_25 : f32 to vector<128x256xf32>
    %54 = arith.mulf %52, %53 : vector<128x256xf32>
    %55 = arith.cmpf ogt, %41, %47 : vector<128x256xf32>
    %cst_26 = arith.constant 1.000000e+00 : f32
    %56 = vector.broadcast %cst_26 : f32 to vector<128x256xf32>
    %57 = arith.select %55, %56, %41 : vector<128x256xi1>, vector<128x256xf32>
    %58 = arith.cmpf ole, %57, %54 : vector<128x256xf32>
    %cst_27 = arith.constant 0.000000e+00 : f32
    %59 = vector.broadcast %cst_27 : f32 to vector<128x256xf32>
    %60 = arith.select %58, %59, %57 : vector<128x256xi1>, vector<128x256xf32>
    %61 = arith.truncf %60 : vector<128x256xf32> to vector<128x256xbf16>
    %c0_28 = arith.constant 0 : index
    %c0_29 = arith.constant 0 : index
    %62 = vector.load %arg7[%c0_28, %c0_29] : memref<128x256xbf16, #tpu.memory_space<vmem>>, vector<128x256xbf16>
    tpu.vector_store %arg7[%c0_28, %c0_29], %61 {strides = array<i32>} : memref<128x256xbf16, #tpu.memory_space<vmem>>, vector<128x256xbf16>,
    return
  }
  func.func @transform_0(%arg0: i32) -> (i32, i32) {
    %c0_i32 = arith.constant 0 : i32
    %c0_i32_0 = arith.constant 0 : i32
    return %arg0, %c0_i32 : i32, i32
  }
  func.func @transform_1(%arg0: i32) -> (i32, i32) {
    %c0_i32 = arith.constant 0 : i32
    %c0_i32_0 = arith.constant 0 : i32
    %c0_i32_1 = arith.constant 0 : i32
    return %c0_i32, %c0_i32_0 : i32, i32
  }
  func.func @transform_2(%arg0: i32) -> (i32, i32) {
    %c0_i32 = arith.constant 0 : i32
    %c0_i32_0 = arith.constant 0 : i32
    %c0_i32_1 = arith.constant 0 : i32
    return %c0_i32, %c0_i32_0 : i32, i32
  }
  func.func @transform_3(%arg0: i32) -> (i32, i32) {
    %c0_i32 = arith.constant 0 : i32
    %c0_i32_0 = arith.constant 0 : i32
    %c0_i32_1 = arith.constant 0 : i32
    return %c0_i32, %c0_i32_0 : i32, i32
  }
  func.func @transform_4(%arg0: i32) -> (i32, i32) {
    %c0_i32 = arith.constant 0 : i32
    %c0_i32_0 = arith.constant 0 : i32
    return %arg0, %c0_i32 : i32, i32
  }
  func.func @transform_5(%arg0: i32) -> (i32, i32) {
    %c0_i32 = arith.constant 0 : i32
    %c0_i32_0 = arith.constant 0 : i32
    return %arg0, %c0_i32 : i32, i32
  }
  func.func @transform_6(%arg0: i32) -> (i32, i32) {
    %c0_i32 = arith.constant 0 : i32
    %c0_i32_0 = arith.constant 0 : i32
    return %arg0, %c0_i32 : i32, i32
  }
  func.func @transform_7(%arg0: i32) -> (i32, i32) {
    %c0_i32 = arith.constant 0 : i32
    %c0_i32_0 = arith.constant 0 : i32
    return %arg0, %c0_i32 : i32, i32
  }
}

</mosaic_0001>

<bundles_post_ra>
// kernel: tpu_custom_call.1
= control target key start
LH: loop header
LB: loop body
LE: loop exit
PB: predicated region body
PF: predicated region fallthrough
CT: control target
= control target key end

     0   :  { %s3768_s0 = inlined_call_operand.hbm [shape: bf16[512,256], index: 0, kind: input, shape index: {}]   ;;  %s3769_s1 = inlined_call_operand.hbm [shape: bf16[128,256], index: 1, kind: input, shape index: {}]   ;;  %s3770_s2 = inlined_call_operand.vmem [shape: f32[1,128], index: 2, kind: input, shape index: {}]   ;;  %s3771_s3 = inlined_call_operand.vmem [shape: f32[1,256], index: 3, kind: input, shape index: {}]   ;;  %s3772_s4 = inlined_call_operand.hbm [shape: s32[512,128], index: 4, kind: input, shape index: {}]   ;;  %s3773_s5 = inlined_call_operand.hbm [shape: s32[512,256], index: 5, kind: input, shape index: {}]   ;;  %s3774_s6 = inlined_call_operand.hbm [shape: bf16[512,256], index: 6, kind: output, shape index: {0}]   ;;  %s3775_s7 = inlined_call_operand.hbm [shape: bf16[512,128], index: 7, kind: output, shape index: {1}]  }
   0x1   :  { %3789 = sst [smem:[#allocation27_spill]] %s3768_s0 }
   0x2   :  { %3790 = sst [smem:[#allocation28_spill]] %s3772_s4 }
   0x3   :  { %13 = vsyncpa [#allocation3], 0 }
   0x4   :  { %15 = vsyncpa [#allocation3 + $0x1], 0 }
   0x5   :  { %16 = vsyncpa [#allocation6], 0 }
   0x6   :  { %17 = vsyncpa [#allocation4], 0 }
   0x7   :  { %19 = vsyncpa [#allocation4 + $0x1], 0 }
   0x8   :  { %20 = vsyncpa [#allocation11], 0 }
   0x9   :  { %22 = vsyncpa [#allocation11 + $0x1], 0  ;;  %s2994_s24 = smov 0   ;;  %s2996_s25 = smov 0  }
   0xa   :  { %s2998_s26 = smov 0   ;;  %s3000_s27 = smov 0  }
   0xb LB: > { %3791 = sst [smem:[#allocation17_spill]] %s2933_s26  ;;  %s3015_s28 = sadd.s32 1, %s2937_s27   ;;  %s2937_s27 = sphi %s3000_s27, %s3842_s27   ;;  %s2933_s26 = sphi %s2998_s26, %s3844_s26   ;;  %s2929_s25 = sphi %s2996_s25, %s3846_s25   ;;  %s2925_s24 = sphi %s2994_s24, %s3845_s24  }
   0xc   : > { %3792 = sst [smem:[#allocation18_spill]] %s3015_s28  ;;  %s35_s29 = sadd.s32 1, %s2933_s26 }
   0xd   : > { %s32_s30 = ssub.s32 %s2937_s27, %s3015_s28  ;;  %p3776_p0 = scmp.ne.s32.totalorder %s2933_s26, %s2929_s25 }
   0xe   : > { %p33_p1 = scmp.eq.s32.totalorder %s32_s30, 0  ;;  %p43_p2 = scmp.eq.s32.totalorder %s2937_s27, 0 }
   0xf   : > { %p2428_p4 = scmp.lt.s32.totalorder %s2937_s27, 4  ;;  %s258_s9 = sand.u32 1, %s2937_s27  }
  0x10   : > { %s3024_s8 = scalar_select %p33_p1, %s2933_s26, %s35_s29  }
  0x11   : > { %p44_p3 = por %p43_p2, %p3776_p0  ;;  %s260_s10 = sand.u32 1, %s2933_s26  }
  0x12   : > { %3793 = sst [smem:[#allocation19_spill]] %s3024_s8  ;;  %s3034_s11 = sshll.u32 %s260_s10, 7 }
  0x13   : > { %s2306_s12 = sshll.u32 %s2937_s27, 11  ;;  %s3794_s0 = sld [smem:[#allocation27_spill]] }
  0x14   : > { %s262_s16 = scalar_lea.vmem [#allocation2], %s3034_s11  ;;  %p3043_p5 = pnand %p2428_p4, %p44_p3 }
  0x15   : > { %s270_s17 = sshll.u32 %s262_s16, 4  ;;  %s3796_s4 = sld [smem:[#allocation28_spill]]  ;;  %s3047_s17 = int_to_ptr.vmem [resolvable:$true] %s270_s17 }
  0x16   : > { %s3795_s18 = scalar_select %p3043_p5, 1, 0 }
  0x17   : > { %s3054_s22 = scalar_lea.sflag [#allocation3], %s258_s9  ;;  %p3060_p7 = pneg %p3043_p5 }
  0x19   : > { %s3040_s15 = scalar_lea.hbm %s3794_s0, %s2306_s12  ;;  %s2718_s14 = scalar_lea.hbm %s3794_s0, 8192 }
  0x1a   : > { %s2713_s23 = scalar_lea.hbm %s3040_s15, 2048  ;;  %p2719_p10 = scmp.lt.u32.totalorder %s3040_s15, %s3794_s0 }
  0x1b   : > { %s3052_s21 = scalar_lea.hbm %s3796_s4, %s2306_s12  ;;  %p2714_p6 = scmp.ne.s32.totalorder %s3040_s15, %s2713_s23 }
  0x1c   : > { %s3797_s29 = scalar_select %p3060_p7, 1, 0 }
  0x1d   : > { %p2716_p8 = pnand %p3060_p7, %p2714_p6  ;;  %p2720_p11 = scmp.lt.u32.totalorder %s2718_s14, %s2713_s23 }
  0x1e   : > { %p2722_p13 = scmp.lt.u32.totalorder %s2713_s23, %s3040_s15 }
  0x1f   : > { %p2717_p9 = pneg %p2716_p8  ;;  %p2721_p12 = por %p2720_p11, %p2719_p10 }
  0x21   : > { %p2723_p1 = por %p2722_p13, %p2721_p12 }
  0x23   : > { %p2724_p2 = pnand %p2723_p1, %p2717_p9 }
  0x25   : > { %2727 = shalt.err (!%p2724_p2)
}
  0x26   : > { %s2728_s9 = scalar_lea.vmem %s3047_s17, 2048  ;;  %s2939_s19 = smov [#allocation2]  }
  0x27   : > { %p2729_p3 = scmp.ne.s32.totalorder %s3047_s17, %s2728_s9  ;;  %s2733_s20 = sshll.u32 %s2939_s19, 4  ;;  %s2734_s20 = int_to_ptr.vmem [resolvable:$false] %s2733_s20 }
  0x28   : > { %s2735_s30 = scalar_lea.vmem %s2734_s20, 4096  ;;  %p2736_p8 = scmp.lt.s32.totalorder %s3047_s17, %s2734_s20 }
  0x29   : > { %p2731_p4 = pnand %p2729_p3, %p3060_p7  ;;  %p2737_p0 = scmp.lt.s32.totalorder %s2735_s30, %s2728_s9 }
  0x2b   : > { %p2732_p6 = pneg %p2731_p4  ;;  %p2738_p10 = por %p2737_p0, %p2736_p8 }
  0x2d   : > { %p2739_p11 = pnand %p2738_p10, %p2732_p6 }
  0x2f   : > { %2742 = shalt.err (!%p2739_p11)
}
  0x30   : > { %s3777_s23 = smov 128   ;;  %s3778_s13 = smov 8  }
  0x31   : > { %2413 = dma.hbm_to_vmem [thread:$0]  (!%p3043_p5), %s3040_s15, 2048, %s3047_s17, %s3054_s22, %s3777_s23, %s3777_s23, %s3778_s13  }
  0x32   : > { %s284_s14 = scalar_lea.vmem [#allocation7], %s3034_s11  ;;  %s3090_s12 = sshll.u32 %s260_s10, 8 }
  0x33   : > { %s291_s16 = sshll.u32 %s284_s14, 4  ;;  %s2743_s9 = scalar_lea.hbm %s3052_s21, 2048  ;;  %s3092_s16 = int_to_ptr.vmem [resolvable:$true] %s291_s16 }
  0x34   : > { %p2744_p0 = scmp.ne.s32.totalorder %s3052_s21, %s2743_s9  ;;  %s2748_s30 = scalar_lea.hbm %s3796_s4, 8192 }
  0x35   : > { %p2749_p13 = scmp.lt.u32.totalorder %s3052_s21, %s3796_s4  ;;  %p2750_p1 = scmp.lt.u32.totalorder %s2748_s30, %s2743_s9 }
  0x36   : > { %p2746_p9 = pnand %p2744_p0, %p3060_p7  ;;  %p2752_p3 = scmp.lt.u32.totalorder %s2743_s9, %s3052_s21 }
  0x37   : > { %p2751_p2 = por %p2750_p1, %p2749_p13 }
  0x38   : > { %p2747_p12 = pneg %p2746_p9 }
  0x39   : > { %p2753_p4 = por %p2752_p3, %p2751_p2 }
  0x3b   : > { %p2754_p6 = pnand %p2753_p4, %p2747_p12 }
  0x3d   : > { %2757 = shalt.err (!%p2754_p6)
}
  0x3e   : > { %s2758_s10 = scalar_lea.vmem %s3092_s16, 2048  ;;  %s2942_s11 = smov [#allocation7]  }
  0x3f   : > { %p2759_p8 = scmp.ne.s32.totalorder %s3092_s16, %s2758_s10  ;;  %s2763_s15 = sshll.u32 %s2942_s11, 4  ;;  %s2764_s15 = int_to_ptr.vmem [resolvable:$false] %s2763_s15 }
  0x40   : > { %s2765_s0 = scalar_lea.vmem %s2764_s15, 4096  ;;  %p2766_p0 = scmp.lt.s32.totalorder %s3092_s16, %s2764_s15 }
  0x41   : > { %p2761_p10 = pnand %p2759_p8, %p3060_p7  ;;  %p2767_p9 = scmp.lt.s32.totalorder %s2765_s0, %s2758_s10 }
  0x43   : > { %p2762_p11 = pneg %p2761_p10  ;;  %p2768_p13 = por %p2767_p9, %p2766_p0 }
  0x45   : > { %p2769_p1 = pnand %p2768_p13, %p2762_p11 }
  0x47   : > { %2772 = shalt.err (!%p2769_p1)
}
  0x48   : > { %2416 = dma.hbm_to_vmem [thread:$0]  (!%p3043_p5), %s3052_s21, 2048, %s3092_s16, %s3054_s22, %s3777_s23, %s3777_s23, %s3778_s13  }
  0x49   : > { %s3120_s8 = sadd.s32 4294967295, %s2937_s27   ;;  %s2073_s17 = sadd.s32 4294967294, %s2937_s27  }
  0x4a   : > { %p48_p12 = scmp.ne.s32.totalorder %s2929_s25, %s2925_s24  ;;  %p3782_p2 = scmp.eq.s32.totalorder %s3120_s8, 0 }
  0x4b   : > { %p187_p3 = scmp.eq.s32.totalorder %s3120_s8, 3  ;;  %p193_p4 = scmp.eq.s32.totalorder %s2073_s17, 3 }
  0x4c   : > { %p2074_p6 = scmp.ge.s32.totalorder %s2937_s27, 1  ;;  %p3130_p8 = por %p3782_p2, %p48_p12 }
  0x4d   : > { %p3799_p10 = scmp.ne.s32.totalorder %s2933_s26, %s2929_s25  ;;  %p3141_p0 = por %p193_p4, %p48_p12 }
  0x4e   : > { %s3798_s14 = scalar_select %p3130_p8, 1, 0 }
  0x4f   : > { %p3137_p11 = por %p187_p3, %p3799_p10  ;;  %p226_p9 = scmp.lt.s32.totalorder %s2937_s27, 5 }
  0x50   : > { %s3801_s16 = scalar_select %p3141_p0, 1, 0 }
  0x51   : > { %s3800_s21 = scalar_select %p3137_p11, 1, 0 }
  0x52   : > { %p3146_p13 = pnand %p2074_p6, %p226_p9  ;;  %s2943_s19 = smov [#allocation5]  }
  0x53   : > { %s238_s20 = sshll.u32 %s2943_s19, 4  ;;  %s2309_s30 = sshll.u32 %s2937_s27, 12  ;;  %s239_s20 = int_to_ptr.vmem [resolvable:$true] %s238_s20 }
  0x54   : > { %s3802_s9 = scalar_select %p3146_p13, 1, 0 }
  0x55   : > { %p2406_p1 = pneg %p3146_p13  ;;  %s3156_s15 = scalar_lea.hbm %s3773_s5, %s2309_s30 }
  0x56   : > { %s305_s0 = scalar_lea.vmem [#allocation8], %s3090_s12  ;;  %s2773_s4 = scalar_lea.hbm %s3769_s1, 2048 }
  0x57   : > { %s313_s17 = sshll.u32 %s305_s0, 4  ;;  %p3161_p12 = pnand %p2406_p1, %p3782_p2  ;;  %s3165_s17 = int_to_ptr.vmem [resolvable:$true] %s313_s17 }
  0x58   : > { %p2774_p3 = scmp.ne.s32.totalorder %s3769_s1, %s2773_s4  ;;  %p2780_p9 = scmp.lt.u32.totalorder %s2773_s4, %s3769_s1 }
  0x59   : > { %p2775_p4 = pneg %p3161_p12 }
  0x5b   : > { %p2776_p6 = pnand %p2775_p4, %p2774_p3 }
  0x5d   : > { %p2777_p10 = pneg %p2776_p6 }
  0x5f   : > { %p2782_p1 = pnand %p2780_p9, %p2777_p10 }
  0x61   : > { %2785 = shalt.err (!%p2782_p1)
}
  0x62   : > { %s2786_s10 = scalar_lea.vmem %s239_s20, 2048  ;;  %p2794_p8 = scmp.lt.s32.totalorder %s239_s20, %s239_s20 }
  0x63   : > { %p2787_p2 = scmp.ne.s32.totalorder %s239_s20, %s2786_s10  ;;  %p2795_p13 = scmp.lt.s32.totalorder %s2786_s10, %s2786_s10 }
  0x65   : > { %p2789_p0 = pnand %p2787_p2, %p2775_p4  ;;  %p2796_p5 = por %p2795_p13, %p2794_p8 }
  0x67   : > { %p2790_p11 = pneg %p2789_p0 }
  0x69   : > { %p2797_p7 = pnand %p2796_p5, %p2790_p11 }
  0x6b   : > { %2800 = shalt.err (!%p2797_p7)
}
  0x6c   : > { %s3804_s26 = smov 8   ;;  %s3805_s28 = smov 128  }
  0x6d   : > { %2409 = dma.hbm_to_vmem [thread:$0]  (!%p3161_p12), %s3769_s1, 2048, %s239_s20, [#allocation6], %s3805_s28, %s3805_s28, %s3804_s26  }
  0x6e   : > { %s2801_s4 = scalar_lea.hbm %s3156_s15, 4096  ;;  %p3806_p0 = scmp.ne.s32.totalorder %s3797_s29, 0 }
  0x6f   : > { %p2802_p2 = scmp.ne.s32.totalorder %s3156_s15, %s2801_s4  ;;  %s2806_s23 = scalar_lea.hbm %s3773_s5, 16384 }
  0x70   : > { %p2807_p7 = scmp.lt.u32.totalorder %s3156_s15, %s3773_s5  ;;  %p2808_p11 = scmp.lt.u32.totalorder %s2806_s23, %s2801_s4 }
  0x71   : > { %p2804_p8 = pnand %p2802_p2, %p3806_p0  ;;  %p2810_p3 = scmp.lt.u32.totalorder %s2801_s4, %s3156_s15 }
  0x72   : > { %p2809_p13 = por %p2808_p11, %p2807_p7 }
  0x73   : > { %p2805_p5 = pneg %p2804_p8 }
  0x74   : > { %p2811_p4 = por %p2810_p3, %p2809_p13 }
  0x76   : > { %p2812_p6 = pnand %p2811_p4, %p2805_p5 }
  0x78   : > { %2815 = shalt.err (!%p2812_p6)
}
  0x79   : > { %s2816_s20 = scalar_lea.vmem %s3165_s17, 4096  ;;  %s2944_s10 = smov [#allocation8]  }
  0x7a   : > { %p2817_p12 = scmp.ne.s32.totalorder %s3165_s17, %s2816_s20  ;;  %s2821_s26 = sshll.u32 %s2944_s10, 4  ;;  %s2822_s26 = int_to_ptr.vmem [resolvable:$false] %s2821_s26 }
  0x7b   : > { %s2823_s28 = scalar_lea.vmem %s2822_s26, 8192  ;;  %p2824_p1 = scmp.lt.s32.totalorder %s3165_s17, %s2822_s26 }
  0x7c   : > { %p2819_p10 = pnand %p2817_p12, %p3806_p0  ;;  %p2825_p2 = scmp.lt.s32.totalorder %s2823_s28, %s2816_s20 }
  0x7e   : > { %p2820_p9 = pneg %p2819_p10  ;;  %p2826_p8 = por %p2825_p2, %p2824_p1 }
  0x80   : > { %p2827_p7 = pnand %p2826_p8, %p2820_p9 }
  0x82   : > { %2830 = shalt.err (!%p2827_p7)
}
  0x83   : > { %s2945_s13 = smov 256   ;;  %s2946_s11 = smov 16  }
  0x84   : > { %p3807_p5 = scmp.ne.s32.totalorder %s3795_s18, 0  ;;  %p3808_p0 = scmp.ne.s32.totalorder %s3802_s9, 0 }
  0x86   : > { %2419 = dma.hbm_to_vmem [thread:$0]  (!%p3807_p5), %s3156_s15, 4096, %s3165_s17, %s3054_s22, %s2945_s13, %s2945_s13, %s2946_s11  }
  0x87   : > { %325 = sbr.rel (%p3808_p0) target bundleno = 806 (0x326), region = 44 }
  0x8e   : > { %s327_s29 = sand.u32 1, %s3120_s8   ;;  %s3212_s4 = sand.u32 1, %s2929_s25  }
  0x8f   : > { %s3215_s0 = sshll.u32 %s3212_s4, 7  ;;  %s328_s19 = scalar_lea.sflag [#allocation3], %s327_s29 }
  0x90   : > { %s3218_s23 = scalar_lea.vmem [#allocation2], %s3215_s0  ;;  %p3809_p11 = scmp.ne.s32.totalorder %s3798_s14, 0 }
  0x92   : > { %2904 = dma.done.wait (%p3809_p11), %s328_s19, 2048  }
  0x93   : > { %2906 = vsyncadd (%p3809_p11), %s328_s19, 4294965248  ;;  %p3810_p13 = scmp.eq.s32.totalorder %s3120_s8, 0 }
  0x95   : > { %2908 = dma.done.wait (%p3810_p13), [#allocation6], 2048   ;;  %p3811_p3 = pmov %p3810_p13 }
  0x96   : > { %s3229_s18 = scalar_lea.vmem [#allocation7], %s3215_s0 }
  0x97   : > { %2910 = vsyncadd (%p3811_p3), [#allocation6], 4294965248 }
  0x98   : > { %2912 = dma.done.wait (%p3809_p11), %s328_s19, 6144  }
  0x99   : > { %2914 = vsyncadd (%p3809_p11), %s328_s19, 4294961152  ;;  %v2473_v0 = vld [vmem:[#allocation5 + $0x4] ss:$8 sps:$4 sm:$0xff]   ;;  %v2475_v1 = vld [vmem:[#allocation5] ss:$8 sps:$4 sm:$0xff]   ;;  %v2947_v32 = vmov 0  }
  0x9a   : > { %604 = vmatprep.subr.bf16.mxu0 %v2473_v0  ;;  %v2476_v2 = vld [vmem:[#allocation5 + $0x14] ss:$8 sps:$4 sm:$0xff]   ;;  %1081 = vmatprep.subr.bf16.mxu1 %v2473_v0  ;;  %v2478_v3 = vld [vmem:[#allocation5 + $0x10] ss:$8 sps:$4 sm:$0xff]   ;;  %v2479_v4 = vld [vmem:[#allocation5 + $0x24] ss:$8 sps:$4 sm:$0xff]  }
  0x9b   : > { %605 = vmatpush1.bf16.xpose.msra.mxu0 %v2475_v1  ;;  %1082 = vmatpush1.bf16.msra.mxu1 %v2475_v1  ;;  %v2481_v5 = vld [vmem:[#allocation5 + $0x20] ss:$8 sps:$4 sm:$0xff]   ;;  %v2482_v6 = vld [vmem:[#allocation5 + $0x34] ss:$8 sps:$4 sm:$0xff]   ;;  %v2499_v7 = vld [vmem:[%s3218_s23 + $0x4] ss:$8 sps:$4 sm:$0xff]  }
  0x9c   : > { %606 = vmatprep.subr.bf16.mxu0 %v2476_v2  ;;  %1083 = vmatprep.subr.bf16.mxu1 %v2476_v2  ;;  %v2484_v8 = vld [vmem:[#allocation5 + $0x30] ss:$8 sps:$4 sm:$0xff]   ;;  %v2485_v9 = vld [vmem:[#allocation5 + $0x44] ss:$8 sps:$4 sm:$0xff]   ;;  %v2487_v10 = vld [vmem:[#allocation5 + $0x40] ss:$8 sps:$4 sm:$0xff]  }
  0x9d   : > { %636 = vmatprep.mubr.bf16.mxu0 %v2499_v7  ;;  %v2488_v11 = vld [vmem:[#allocation5 + $0x54] ss:$8 sps:$4 sm:$0xff]   ;;  %v2490_v12 = vld [vmem:[#allocation5 + $0x50] ss:$8 sps:$4 sm:$0xff]   ;;  %v2491_v13 = vld [vmem:[#allocation5 + $0x64] ss:$8 sps:$4 sm:$0xff]   ;;  %1113 = vmatprep.mubr.bf16.mxu1 %v2947_v32 }
  0x9e   : > { %v2493_v14 = vld [vmem:[#allocation5 + $0x60] ss:$8 sps:$4 sm:$0xff]   ;;  %v2494_v15 = vld [vmem:[#allocation5 + $0x74] ss:$8 sps:$4 sm:$0xff]   ;;  %v2496_v16 = vld [vmem:[#allocation5 + $0x70] ss:$8 sps:$4 sm:$0xff]  }
  0x9f   : > { %1084 = vmatpush1.bf16.msra.mxu1 %v2478_v3  ;;  %v2497_v17 = vld [vmem:[%s3218_s23] ss:$8 sps:$4 sm:$0xff]   ;;  %v2500_v18 = vld [vmem:[%s3218_s23 + $0x14] ss:$8 sps:$4 sm:$0xff]   ;;  %v2502_v19 = vld [vmem:[%s3218_s23 + $0x10] ss:$8 sps:$4 sm:$0xff]  }
  0xa0   : > { %1085 = vmatprep.subr.bf16.mxu1 %v2479_v4  ;;  %v2503_v20 = vld [vmem:[%s3218_s23 + $0x24] ss:$8 sps:$4 sm:$0xff]   ;;  %v2505_v21 = vld [vmem:[%s3218_s23 + $0x20] ss:$8 sps:$4 sm:$0xff]   ;;  %v2506_v22 = vld [vmem:[%s3218_s23 + $0x34] ss:$8 sps:$4 sm:$0xff]  }
  0xa1   : > { %v2508_v23 = vld [vmem:[%s3218_s23 + $0x30] ss:$8 sps:$4 sm:$0xff]   ;;  %v2509_v24 = vld [vmem:[%s3218_s23 + $0x44] ss:$8 sps:$4 sm:$0xff]   ;;  %v2511_v25 = vld [vmem:[%s3218_s23 + $0x40] ss:$8 sps:$4 sm:$0xff]  }
  0xa2   : > { %v2512_v26 = vld [vmem:[%s3218_s23 + $0x54] ss:$8 sps:$4 sm:$0xff]   ;;  %v2514_v27 = vld [vmem:[%s3218_s23 + $0x50] ss:$8 sps:$4 sm:$0xff]   ;;  %v2515_v28 = vld [vmem:[%s3218_s23 + $0x64] ss:$8 sps:$4 sm:$0xff]  }
  0xa3   : > { %607 = vmatpush1.bf16.xpose.msra.mxu0 %v2478_v3  ;;  %1086 = vmatpush1.bf16.msra.mxu1 %v2481_v5  ;;  %v2517_v29 = vld [vmem:[%s3218_s23 + $0x60] ss:$8 sps:$4 sm:$0xff]   ;;  %v2518_v30 = vld [vmem:[%s3218_s23 + $0x74] ss:$8 sps:$4 sm:$0xff]   ;;  %v2520_v31 = vld [vmem:[%s3218_s23 + $0x70] ss:$8 sps:$4 sm:$0xff]  }
  0xa4   : > { %608 = vmatprep.subr.bf16.mxu0 %v2479_v4  ;;  %1087 = vmatprep.subr.bf16.mxu1 %v2482_v6  ;;  %v3255_v33 = vld [vmem:[%s3770_s2] ss:$0 sm:$0xff]  ;;  %v798_v51 = vld [vmem:[%s3229_s18 + $0x8] sm:$0xff]  ;;  %v799_v60 = vld [vmem:[%s3229_s18 + $0x10] sm:$0xff]  ;;  %s2094_s9 = sshll.u32 %s3212_s4, 6  ;;  %s2092_s17 = sshll.u32 %s3212_s4, 8 }
  0xa5   : > { %v797_v50 = vld [vmem:[%s3229_s18] sm:$0xff]  ;;  %v814_v59 = vand.u32 65535, %v798_v51  ;;  %v800_v3 = vld [vmem:[%s3229_s18 + $0x18] sm:$0xff]  ;;  %v2145_v4 = vshrl.u32 %v798_v51, 16  ;;  %s3293_s15 = scalar_lea.vmem [#allocation10], %s2094_s9  ;;  %s3371_s12 = scalar_lea.vmem [#allocation8], %s2092_s17 }
  0xa6   : > { %v813_v58 = vand.u32 65535, %v797_v50  ;;  %v2144_v2 = vshrl.u32 %v797_v50, 16  ;;  %s2344_s10 = sshll.u32 %s3120_s8, 10  ;;  %s1918_s26 = sshll.u32 %s3293_s15, 4  ;;  %s3446_s26 = int_to_ptr.vmem [resolvable:$true] %s1918_s26 }
  0xa7   : > { %1088 = vmatpush1.bf16.msra.mxu1 %v2484_v8  ;;  %s3444_s11 = scalar_lea.hbm %s3775_s7, %s2344_s10  ;;  %s1888_s29 = scalar_lea.sflag [#allocation11], %s3212_s4 }
  0xa8   : > { %1089 = vmatprep.subr.bf16.mxu1 %v2485_v9  ;;  %v829_v7 = vcvt.s32.f32 %v813_v58  ;;  %s2831_s19 = scalar_lea.vmem %s3446_s26, 1024  ;;  %p3824_p6 = scmp.ne.s32.totalorder %s3800_s21, 0 }
  0xa9   : > { %p2832_p4 = scmp.ne.s32.totalorder %s3446_s26, %s2831_s19  ;;  %s2948_s23 = smov [#allocation10]  }
  0xab   : > { %609 = vmatpush1.bf16.xpose.msra.mxu0 %v2481_v5  ;;  %1090 = vmatpush1.bf16.msra.mxu1 %v2487_v10  ;;  %v815_v5 = vand.u32 65535, %v799_v60  ;;  %p2833_p12 = pnand %p2832_p4, %p3824_p6 }
  0xac   : > { %610 = vmatprep.subr.bf16.mxu0 %v2482_v6  ;;  %1091 = vmatprep.subr.bf16.mxu1 %v2488_v11 }
  0xad   : > { %p2834_p10 = pneg %p2833_p12 }
  0xaf   : > { %1092 = vmatpush1.bf16.msra.mxu1 %v2490_v12 }
  0xb0   : > { %1093 = vmatprep.subr.bf16.mxu1 %v2491_v13 }
  0xb3   : > { %611 = vmatpush1.bf16.xpose.msra.mxu0 %v2484_v8  ;;  %1094 = vmatpush1.bf16.msra.mxu1 %v2493_v14  ;;  %v830_v8 = vcvt.s32.f32 %v814_v59  ;;  %v803_v59 = vld [vmem:[%s3229_s18 + $0x30] sm:$0xff] }
  0xb4   : > { %612 = vmatprep.subr.bf16.mxu0 %v2485_v9  ;;  %1095 = vmatprep.subr.bf16.mxu1 %v2494_v15  ;;  %v816_v9 = vand.u32 65535, %v800_v3 }
  0xb7   : > { %1096 = vmatpush1.bf16.msra.mxu1 %v2496_v16 }
  0xbb   : > { %613 = vmatpush1.bf16.xpose.msra.mxu0 %v2487_v10 }
  0xbc   : > { %614 = vmatprep.subr.bf16.mxu0 %v2488_v11  ;;  %v893_v11 = vcvt.s32.f32 %v2144_v2 }
  0xc3   : > { %615 = vmatpush1.bf16.xpose.msra.mxu0 %v2490_v12 }
  0xc4   : > { %616 = vmatprep.subr.bf16.mxu0 %v2491_v13 }
  0xcb   : > { %617 = vmatpush1.bf16.xpose.msra.mxu0 %v2493_v14  ;;  %v894_v14 = vcvt.s32.f32 %v2145_v4 }
  0xcc   : > { %618 = vmatprep.subr.bf16.mxu0 %v2494_v15  ;;  %v831_v15 = vcvt.s32.f32 %v815_v5 }
  0xd3   : > { %619 = vmatpush1.bf16.xpose.msra.mxu0 %v2496_v16  ;;  %v801_v16 = vld [vmem:[%s3229_s18 + $0x20] sm:$0xff] }
  0xda   : > { %637 = vmatmul.mubr.bf16.vlgmr.msra.gmra.mrb[0].mxu0 %v2497_v17 }
  0xdb   : > { %644 = vmatprep.mubr.bf16.mxu0 %v2500_v18 }
  0xe2   : > { %645 = vmatmul.mubr.bf16.gmra.mrb[4].mxu0 %v2502_v19 }
  0xe3   : > { %652 = vmatprep.mubr.bf16.mxu0 %v2503_v20  ;;  %v845_v20 = vmul.f32 1.5258789e-05, %v829_v7 }
  0xea   : > { %653 = vmatmul.mubr.bf16.gmra.mrb[8].mxu0 %v2505_v21  ;;  %v846_v21 = vmul.f32 1.5258789e-05, %v830_v8  ;;  %v819_v8 = vand.u32 65535, %v803_v59 }
  0xeb   : > { %660 = vmatprep.mubr.bf16.mxu0 %v2506_v22  ;;  %v2146_v22 = vshrl.u32 %v799_v60, 16  ;;  %v3284_v60 = vld [vmem:[%s3229_s18 + $0x38] sm:$0xff] }
  0xf2   : > { %661 = vmatmul.mubr.bf16.gmra.mrb[12].mxu0 %v2508_v23  ;;  %v3270_v23 = vld [vmem:[%s3229_s18 + $0x28] sm:$0xff] }
  0xf3   : > { %668 = vmatprep.mubr.bf16.mxu0 %v2509_v24 }
  0xfa   : > { %669 = vmatmul.mubr.bf16.gmra.mrb[16].mxu0 %v2511_v25 }
  0xfb   : > { %676 = vmatprep.mubr.bf16.mxu0 %v2512_v26  ;;  %v832_v26 = vcvt.s32.f32 %v816_v9  ;;  %v820_v9 = vand.u32 65535, %v3284_v60 }
 0x102   : > { %677 = vmatmul.mubr.bf16.gmra.mrb[20].mxu0 %v2514_v27  ;;  %v2147_v27 = vshrl.u32 %v800_v3, 16 }
 0x103   : > { %684 = vmatprep.mubr.bf16.mxu0 %v2515_v28 }
 0x10a   : > { %685 = vmatmul.mubr.bf16.gmra.mrb[24].mxu0 %v2517_v29 }
 0x10b   : > { %692 = vmatprep.mubr.bf16.mxu0 %v2518_v30 }
 0x112   : > { %693 = vmatmul.mubr.bf16.gmra.mrb[28].mxu0 %v2520_v31  ;;  %v909_v31 = vmul.f32 1.5258789e-05, %v893_v11 }
 0x1ad   : > { %v638_v34 = vpop.f32.mrb[0].mxu0 }
 0x1ae   : > { %v639_v35 = vadd.f32 %v3255_v33, %v638_v34  ;;  %v640_v36 = vpop.f32.mrb[1].mxu0  ;;  %v817_v34 = vand.u32 65535, %v801_v16 }
 0x1af   : > { %v641_v37 = vpop.f32.mrb[2].mxu0  ;;  %v910_v36 = vmul.f32 1.5258789e-05, %v894_v14 }
 0x1b0   : > { %v2128_v38 = vmul.f32 -1.442695, %v639_v35  ;;  %v642_v39 = vadd.f32 %v3255_v33, %v641_v37  ;;  %v643_v40 = vpop.f32.mrb[3].mxu0  ;;  %v847_v37 = vmul.f32 1.5258789e-05, %v831_v15 }
 0x1b1   : > { %v2148_v40 = vshrl.u32 %v801_v16, 16 }
 0x1b2   : > { %2521 = vpow2.f32 %v2128_v38  ;;  %v2129_v41 = vmul.f32 -1.442695, %v642_v39  ;;  %v818_v38 = vand.u32 65535, %v3270_v23 }
 0x1b3   : > { %v897_v58 = vcvt.s32.f32 %v2148_v40 }
 0x1b4   : > { %2523 = vpow2.f32 %v2129_v41  ;;  %v834_v51 = vcvt.s32.f32 %v818_v38 }
 0x1b5   : > { %v646_v42 = vpop.f32.mrb[4].mxu0  ;;  %v3297_v16 = vmul.f32 1.5258789e-05, %v897_v58 }
 0x1b6   : > { %v647_v43 = vadd.f32 %v3255_v33, %v646_v42  ;;  %v648_v44 = vpop.f32.mrb[5].mxu0  ;;  %v850_v14 = vmul.f32 1.5258789e-05, %v834_v51 }
 0x1b7   : > { %v649_v45 = vpop.f32.mrb[6].mxu0  ;;  %v895_v44 = vcvt.s32.f32 %v2146_v22  ;;  %v835_v22 = vcvt.s32.f32 %v819_v8 }
 0x1b8   : > { %v2130_v46 = vmul.f32 -1.442695, %v647_v43  ;;  %v650_v47 = vadd.f32 %v3255_v33, %v649_v45  ;;  %v651_v48 = vpop.f32.mrb[7].mxu0  ;;  %v848_v43 = vmul.f32 1.5258789e-05, %v832_v26  ;;  %v896_v45 = vcvt.s32.f32 %v2147_v27 }
 0x1b9   : > { %v911_v5 = vmul.f32 1.5258789e-05, %v895_v44 }
 0x1ba   : > { %2525 = vpow2.f32 %v2130_v46  ;;  %v2131_v49 = vmul.f32 -1.442695, %v650_v47  ;;  %v833_v47 = vcvt.s32.f32 %v817_v34  ;;  %v912_v7 = vmul.f32 1.5258789e-05, %v896_v45 }
 0x1bc   : > { %v2522_v52 = vpop.eup %2521  ;;  %2527 = vpow2.f32 %v2131_v49  ;;  %v849_v11 = vmul.f32 1.5258789e-05, %v833_v47 }
 0x1bd   : > { %v749_v53 = vadd.f32 1.0, %v2522_v52  ;;  %v654_v54 = vpop.f32.mrb[8].mxu0  ;;  %v2149_v52 = vshrl.u32 %v3270_v23, 16  ;;  %v836_v23 = vcvt.s32.f32 %v820_v9 }
 0x1be   : > { %v2524_v55 = vpop.eup %2523  ;;  %v655_v56 = vadd.f32 %v3255_v33, %v654_v54  ;;  %v656_v57 = vpop.f32.mrb[9].mxu0 }
 0x1bf   : > { %2529 = vrcp.f32 %v749_v53  ;;  %v750_v61 = vadd.f32 1.0, %v2524_v55  ;;  %v657_v62 = vpop.f32.mrb[10].mxu0  ;;  %v898_v15 = vcvt.s32.f32 %v2149_v52  ;;  %v852_v51 = vmul.f32 1.5258789e-05, %v836_v23 }
 0x1c0   : > { %v2132_v63 = vmul.f32 -1.442695, %v655_v56  ;;  %v658_v0 = vadd.f32 %v3255_v33, %v657_v62  ;;  %v659_v1 = vpop.f32.mrb[11].mxu0 }
 0x1c1   : > { %2531 = vrcp.f32 %v750_v61  ;;  %v914_v44 = vmul.f32 1.5258789e-05, %v898_v15  ;;  %v807_v15 = vld [vmem:[%s3229_s18 + $0x50] sm:$0xff] }
 0x1c2   : > { %2533 = vpow2.f32 %v2132_v63  ;;  %v2133_v6 = vmul.f32 -1.442695, %v658_v0  ;;  %v823_v27 = vand.u32 65535, %v807_v15 }
 0x1c4   : > { %v2526_v10 = vpop.eup %2525  ;;  %2535 = vpow2.f32 %v2133_v6 }
 0x1c5   : > { %v751_v12 = vadd.f32 1.0, %v2526_v10  ;;  %v662_v13 = vpop.f32.mrb[12].mxu0 }
 0x1c6   : > { %v2528_v17 = vpop.eup %2527  ;;  %v663_v18 = vadd.f32 %v3255_v33, %v662_v13  ;;  %v664_v19 = vpop.f32.mrb[13].mxu0 }
 0x1c7   : > { %2537 = vrcp.f32 %v751_v12  ;;  %v752_v24 = vadd.f32 1.0, %v2528_v17  ;;  %v665_v25 = vpop.f32.mrb[14].mxu0 }
 0x1c8   : > { %v2134_v28 = vmul.f32 -1.442695, %v663_v18  ;;  %v666_v29 = vadd.f32 %v3255_v33, %v665_v25  ;;  %v667_v30 = vpop.f32.mrb[15].mxu0  ;;  %v2150_v18 = vshrl.u32 %v803_v59, 16 }
 0x1c9   : > { %v2530_v35 = vpop.eup %2529  ;;  %2539 = vrcp.f32 %v752_v24  ;;  %v805_v30 = vld [vmem:[%s3229_s18 + $0x40] sm:$0xff] }
 0x1ca   : > { %2541 = vpow2.f32 %v2134_v28  ;;  %v2135_v39 = vmul.f32 -1.442695, %v666_v29  ;;  %vm925_vm0 = vcmp.gt.f32.partialorder %v2530_v35, %v845_v20  ;;  %v2151_v29 = vshrl.u32 %v3284_v60, 16 }
 0x1cb   : > { %v2532_v41 = vpop.eup %2531  ;;  %v941_v42 = vsel %vm925_vm0, 1.0, %v2530_v35  ;;  %v821_v45 = vand.u32 65535, %v805_v30  ;;  %v2152_v59 = vshrl.u32 %v805_v30, 16 }
 0x1cc   : > { %v2534_v46 = vpop.eup %2533  ;;  %2543 = vpow2.f32 %v2135_v39  ;;  %vm926_vm1 = vcmp.gt.f32.partialorder %v2532_v41, %v846_v21  ;;  %vm957_vm2 = vcmp.le.f32.partialorder %v941_v42, %v909_v31  ;;  %v900_v52 = vcvt.s32.f32 %v2151_v29 }
 0x1cd   : > { %v753_v48 = vadd.f32 1.0, %v2534_v46  ;;  %v670_v49 = vpop.f32.mrb[16].mxu0  ;;  %v942_v50 = vsel %vm926_vm1, 1.0, %v2532_v41  ;;  %vm3278_vm4 = vmneg %vm957_vm2  ;;  %v973_v63 = vsel %vm957_vm2, 0.0, %v941_v42  ;;  %v837_v58 = vcvt.s32.f32 %v821_v45 }
 0x1ce   : > { %v2536_v53 = vpop.eup %2535  ;;  %v671_v54 = vadd.f32 %v3255_v33, %v670_v49  ;;  %v672_v55 = vpop.f32.mrb[17].mxu0  ;;  %vm958_vm3 = vcmp.le.f32.partialorder %v942_v50, %v910_v36  ;;  %v2179_v57 = vpack.c.bf16 %v942_v50, %v941_v42  ;;  %v899_v42 = vcvt.s32.f32 %v2150_v18 }
 0x1cf   : > { %2545 = vrcp.f32 %v753_v48  ;;  %v754_v61 = vadd.f32 1.0, %v2536_v53  ;;  %v673_v62 = vpop.f32.mrb[18].mxu0  ;;  %v974_v0 = vsel %vm958_vm3, 0.0, %v942_v50  ;;  %vm2176_vm5 = vmneg %vm958_vm3  ;;  %v851_v50 = vmul.f32 1.5258789e-05, %v835_v22 }
 0x1d0   : > { %v2136_v1 = vmul.f32 -1.442695, %v671_v54  ;;  %v674_v2 = vadd.f32 %v3255_v33, %v673_v62  ;;  %v675_v3 = vpop.f32.mrb[19].mxu0  ;;  %v2348_v4 = vpack.c.bf16 %v974_v0, %v973_v63  ;;  %vm2178_vm6 = vmpackc.low %vm2176_vm5, %vm3278_vm4  ;;  %v915_v54 = vmul.f32 1.5258789e-05, %v899_v42 }
 0x1d1   : > { %v2538_v6 = vpop.eup %2537  ;;  %2547 = vrcp.f32 %v754_v61  ;;  %2180 = vmatmul.mubr.msk.bf16.vlgmr.msra.gmra.mrb[0].mxu1 %vm2178_vm6, %v2179_v57  ;;  %v853_v18 = vmul.f32 1.5258789e-05, %v837_v58 }
 0x1d2   : > { %2549 = vpow2.f32 %v2136_v1  ;;  %v2137_v10 = vmul.f32 -1.442695, %v674_v2  ;;  %2349 = vst [vmem:[%s3293_s15] sm:$0xff] %v2348_v4   ;;  %1123 = vmatprep.mubr.bf16.mxu1 %v2947_v32  ;;  %vm927_vm7 = vcmp.gt.f32.partialorder %v2538_v6, %v847_v37  ;;  %v3309_v37 = vld [vmem:[%s3229_s18 + $0x48] sm:$0xff] }
 0x1d3   : > { %v2540_v12 = vpop.eup %2539  ;;  %v943_v13 = vsel %vm927_vm7, 1.0, %v2538_v6  ;;  %v822_v47 = vand.u32 65535, %v3309_v37 }
 0x1d4   : > { %v2542_v17 = vpop.eup %2541  ;;  %2551 = vpow2.f32 %v2137_v10  ;;  %vm928_vm8 = vcmp.gt.f32.partialorder %v2540_v12, %v848_v43  ;;  %vm959_vm9 = vcmp.le.f32.partialorder %v943_v13, %v911_v5  ;;  %v2153_v10 = vshrl.u32 %v3309_v37, 16 }
 0x1d5   : > { %v755_v19 = vadd.f32 1.0, %v2542_v17  ;;  %v678_v20 = vpop.f32.mrb[20].mxu0  ;;  %v944_v21 = vsel %vm928_vm8, 1.0, %v2540_v12  ;;  %vm3301_vm11 = vmneg %vm959_vm9  ;;  %v975_v35 = vsel %vm959_vm9, 0.0, %v943_v13  ;;  %v838_v1 = vcvt.s32.f32 %v822_v47 }
 0x1d6   : > { %v2544_v24 = vpop.eup %2543  ;;  %v679_v25 = vadd.f32 %v3255_v33, %v678_v20  ;;  %v680_v26 = vpop.f32.mrb[21].mxu0  ;;  %vm960_vm10 = vcmp.le.f32.partialorder %v944_v21, %v912_v7  ;;  %v2184_v28 = vpack.c.bf16 %v944_v21, %v943_v13  ;;  %v901_v12 = vcvt.s32.f32 %v2152_v59  ;;  %v808_v20 = vld [vmem:[%s3229_s18 + $0x58] sm:$0xff] }
 0x1d7   : > { %2553 = vrcp.f32 %v755_v19  ;;  %v756_v31 = vadd.f32 1.0, %v2544_v24  ;;  %v681_v34 = vpop.f32.mrb[22].mxu0  ;;  %v976_v36 = vsel %vm960_vm10, 0.0, %v944_v21  ;;  %vm2181_vm12 = vmneg %vm960_vm10  ;;  %v854_v19 = vmul.f32 1.5258789e-05, %v838_v1 }
 0x1d8   : > { %v2138_v38 = vmul.f32 -1.442695, %v679_v25  ;;  %v682_v39 = vadd.f32 %v3255_v33, %v681_v34  ;;  %v683_v40 = vpop.f32.mrb[23].mxu0  ;;  %v2353_v41 = vpack.c.bf16 %v976_v36, %v975_v35  ;;  %vm2183_vm13 = vmpackc.low %vm2181_vm12, %vm3301_vm11  ;;  %v902_v22 = vcvt.s32.f32 %v2153_v10 }
 0x1d9   : > { %v2546_v43 = vpop.eup %2545  ;;  %2555 = vrcp.f32 %v756_v31  ;;  %2185 = vmatmul.mubr.msk.bf16.gmra.mrb[4].mxu1 %vm2183_vm13, %v2184_v28  ;;  %v917_v26 = vmul.f32 1.5258789e-05, %v901_v12  ;;  %v824_v35 = vand.u32 65535, %v808_v20  ;;  %v839_v47 = vcvt.s32.f32 %v823_v27 }
 0x1da   : > { %2557 = vpow2.f32 %v2138_v38  ;;  %v2139_v46 = vmul.f32 -1.442695, %v682_v39  ;;  %2385 = vst [vmem:[%s3293_s15 + $0x8] sm:$0xff] %v2353_v41   ;;  %1133 = vmatprep.mubr.bf16.mxu1 %v2947_v32  ;;  %vm929_vm14 = vcmp.gt.f32.partialorder %v2546_v43, %v849_v11 }
 0x1db   : > { %v2548_v48 = vpop.eup %2547  ;;  %v945_v49 = vsel %vm929_vm14, 1.0, %v2546_v43  ;;  %v855_v63 = vmul.f32 1.5258789e-05, %v839_v47 }
 0x1dc   : > { %v2550_v53 = vpop.eup %2549  ;;  %2559 = vpow2.f32 %v2139_v46  ;;  %vm930_vm15 = vcmp.gt.f32.partialorder %v2548_v48, %v850_v14  ;;  %vm961_vm0 = vcmp.le.f32.partialorder %v945_v49, %v3297_v16  ;;  %v916_v14 = vmul.f32 1.5258789e-05, %v900_v52 }
 0x1dd   : > { %v757_v55 = vadd.f32 1.0, %v2550_v53  ;;  %v686_v56 = vpop.f32.mrb[24].mxu0  ;;  %v946_v57 = vsel %vm930_vm15, 1.0, %v2548_v48  ;;  %vm3321_vm2 = vmneg %vm961_vm0  ;;  %v977_v4 = vsel %vm961_vm0, 0.0, %v945_v49  ;;  %v918_v46 = vmul.f32 1.5258789e-05, %v902_v22  ;;  %v812_v22 = vld [vmem:[%s3229_s18 + $0x78] sm:$0xff] }
 0x1de   : > { %v2552_v60 = vpop.eup %2551  ;;  %v687_v61 = vadd.f32 %v3255_v33, %v686_v56  ;;  %v688_v62 = vpop.f32.mrb[25].mxu0  ;;  %vm962_vm1 = vcmp.le.f32.partialorder %v946_v57, %v914_v44  ;;  %v2189_v0 = vpack.c.bf16 %v946_v57, %v945_v49  ;;  %v2154_v44 = vshrl.u32 %v807_v15, 16  ;;  %v809_v49 = vld [vmem:[%s3229_s18 + $0x60] sm:$0xff]  ;;  %v811_v15 = vld [vmem:[%s3229_s18 + $0x70] sm:$0xff] }
 0x1df   : > { %2561 = vrcp.f32 %v757_v55  ;;  %v758_v2 = vadd.f32 1.0, %v2552_v60  ;;  %v689_v3 = vpop.f32.mrb[26].mxu0  ;;  %v978_v5 = vsel %vm962_vm1, 0.0, %v946_v57  ;;  %vm2186_vm3 = vmneg %vm962_vm1  ;;  %v840_v53 = vcvt.s32.f32 %v824_v35 }
 0x1e0   : > { %v2140_v6 = vmul.f32 -1.442695, %v687_v61  ;;  %v690_v7 = vadd.f32 %v3255_v33, %v689_v3  ;;  %v691_v8 = vpop.f32.mrb[27].mxu0  ;;  %v2358_v9 = vpack.c.bf16 %v978_v5, %v977_v4  ;;  %vm2188_vm4 = vmpackc.low %vm2186_vm3, %vm3321_vm2  ;;  %v903_v55 = vcvt.s32.f32 %v2154_v44 }
 0x1e1   : > { %v2554_v11 = vpop.eup %2553  ;;  %2563 = vrcp.f32 %v758_v2  ;;  %2190 = vmatmul.mubr.msk.bf16.gmra.mrb[8].mxu1 %vm2188_vm4, %v2189_v0  ;;  %v825_v58 = vand.u32 65535, %v809_v49  ;;  %v856_v5 = vmul.f32 1.5258789e-05, %v840_v53  ;;  %v827_v27 = vand.u32 65535, %v811_v15 }
 0x1e2   : > { %2565 = vpow2.f32 %v2140_v6  ;;  %v2141_v13 = vmul.f32 -1.442695, %v690_v7  ;;  %2386 = vst [vmem:[%s3293_s15 + $0x10] sm:$0xff] %v2358_v9   ;;  %1143 = vmatprep.mubr.bf16.mxu1 %v2947_v32  ;;  %vm931_vm5 = vcmp.gt.f32.partialorder %v2554_v11, %v851_v50  ;;  %v810_v50 = vld [vmem:[%s3229_s18 + $0x68] sm:$0xff]  ;;  %v919_v6 = vmul.f32 1.5258789e-05, %v903_v55  ;;  %s2835_s18 = sshll.u32 %s2948_s23, 4  ;;  %s2836_s18 = int_to_ptr.vmem [resolvable:$false] %s2835_s18 }
 0x1e3   : > { %v2556_v16 = vpop.eup %2555  ;;  %v947_v17 = vsel %vm931_vm5, 1.0, %v2554_v11  ;;  %v826_v59 = vand.u32 65535, %v810_v50  ;;  %v2156_v7 = vshrl.u32 %v809_v49, 16  ;;  %v841_v9 = vcvt.s32.f32 %v825_v58  ;;  %s2837_s22 = scalar_lea.vmem %s2836_s18, 2048  ;;  %p2838_p9 = scmp.lt.s32.totalorder %s3446_s26, %s2836_s18 }
 0x1e4   : > { %v2558_v21 = vpop.eup %2557  ;;  %2567 = vpow2.f32 %v2141_v13  ;;  %vm932_vm6 = vcmp.gt.f32.partialorder %v2556_v16, %v852_v51  ;;  %vm963_vm7 = vcmp.le.f32.partialorder %v947_v17, %v915_v54  ;;  %v2157_v12 = vshrl.u32 %v810_v50, 16  ;;  %p2839_p1 = scmp.lt.s32.totalorder %s2837_s22, %s2831_s19 }
 0x1e5   : > { %v759_v23 = vadd.f32 1.0, %v2558_v21  ;;  %v694_v24 = vpop.f32.mrb[28].mxu0  ;;  %v948_v25 = vsel %vm932_vm6, 1.0, %v2556_v16  ;;  %vm3337_vm9 = vmneg %vm963_vm7  ;;  %v979_v38 = vsel %vm963_vm7, 0.0, %v947_v17  ;;  %v842_v10 = vcvt.s32.f32 %v826_v59 }
 0x1e6   : > { %v2560_v28 = vpop.eup %2559  ;;  %v695_v29 = vadd.f32 %v3255_v33, %v694_v24  ;;  %v696_v30 = vpop.f32.mrb[29].mxu0  ;;  %vm964_vm8 = vcmp.le.f32.partialorder %v948_v25, %v916_v14  ;;  %v2194_v34 = vpack.c.bf16 %v948_v25, %v947_v17  ;;  %v905_v17 = vcvt.s32.f32 %v2156_v7  ;;  %v1391_v7 = vld [vmem:[%s3371_s12 + $0x28] sm:$0xff]  ;;  %p2840_p2 = por %p2839_p1, %p2838_p9 }
 0x1e7   : > { %2569 = vrcp.f32 %v759_v23  ;;  %v760_v36 = vadd.f32 1.0, %v2560_v28  ;;  %v697_v37 = vpop.f32.mrb[30].mxu0  ;;  %v980_v39 = vsel %vm964_vm8, 0.0, %v948_v25  ;;  %vm2191_vm10 = vmneg %vm964_vm8  ;;  %v858_v21 = vmul.f32 1.5258789e-05, %v842_v10 }
 0x1e8   : > { %v2142_v40 = vmul.f32 -1.442695, %v695_v29  ;;  %v698_v41 = vadd.f32 %v3255_v33, %v697_v37  ;;  %v699_v42 = vpop.f32.mrb[31].mxu0  ;;  %v2363_v43 = vpack.c.bf16 %v980_v39, %v979_v38  ;;  %vm2193_vm11 = vmpackc.low %vm2191_vm10, %vm3337_vm9  ;;  %v2155_v33 = vshrl.u32 %v808_v20, 16  ;;  %p2841_p8 = pnand %p2840_p2, %p2834_p10 }
 0x1e9   : > { %v2562_v45 = vpop.eup %2561  ;;  %2571 = vrcp.f32 %v760_v36  ;;  %2195 = vmatmul.mubr.msk.bf16.gmra.mrb[12].mxu1 %vm2193_vm11, %v2194_v34  ;;  %v857_v20 = vmul.f32 1.5258789e-05, %v841_v9  ;;  %v921_v34 = vmul.f32 1.5258789e-05, %v905_v17  ;;  %v828_v35 = vand.u32 65535, %v812_v22 }
 0x1ea   : > { %2573 = vpow2.f32 %v2142_v40  ;;  %v2143_v48 = vmul.f32 -1.442695, %v698_v41  ;;  %2387 = vst [vmem:[%s3293_s15 + $0x18] sm:$0xff] %v2363_v43   ;;  %1153 = vmatprep.mubr.bf16.mxu1 %v2947_v32  ;;  %vm933_vm12 = vcmp.gt.f32.partialorder %v2562_v45, %v853_v18  ;;  %v904_v0 = vcvt.s32.f32 %v2155_v33 }
 0x1eb   : > { %v2564_v51 = vpop.eup %2563  ;;  %v949_v52 = vsel %vm933_vm12, 1.0, %v2562_v45  ;;  %v2158_v36 = vshrl.u32 %v811_v15, 16  ;;  %v843_v39 = vcvt.s32.f32 %v827_v27  ;;  %v2159_v40 = vshrl.u32 %v812_v22, 16 }
 0x1ec   : > { %v2566_v54 = vpop.eup %2565  ;;  %2575 = vpow2.f32 %v2143_v48  ;;  %vm934_vm13 = vcmp.gt.f32.partialorder %v2564_v51, %v854_v19  ;;  %vm965_vm14 = vcmp.le.f32.partialorder %v949_v52, %v917_v26  ;;  %v920_v11 = vmul.f32 1.5258789e-05, %v904_v0  ;;  %v1387_v0 = vld [vmem:[%s3371_s12 + $0x8] sm:$0xff] }
 0x1ed   : > { %v761_v56 = vadd.f32 1.0, %v2566_v54  ;;  %v950_v57 = vsel %vm934_vm13, 1.0, %v2564_v51  ;;  %vm3349_vm0 = vmneg %vm965_vm14  ;;  %v981_v2 = vsel %vm965_vm14, 0.0, %v949_v52  ;;  %v906_v26 = vcvt.s32.f32 %v2157_v12  ;;  %v1392_v12 = vld [vmem:[%s3371_s12 + $0x30] sm:$0xff] }
 0x1ee   : > { %v2568_v60 = vpop.eup %2567  ;;  %vm966_vm15 = vcmp.le.f32.partialorder %v950_v57, %v918_v46  ;;  %v2199_v62 = vpack.c.bf16 %v950_v57, %v949_v52  ;;  %v844_v43 = vcvt.s32.f32 %v828_v35  ;;  %v907_v44 = vcvt.s32.f32 %v2158_v36 }
 0x1ef   : > { %2577 = vrcp.f32 %v761_v56  ;;  %v762_v1 = vadd.f32 1.0, %v2568_v60  ;;  %v982_v3 = vsel %vm966_vm15, 0.0, %v950_v57  ;;  %vm2196_vm1 = vmneg %vm966_vm15  ;;  %v922_v38 = vmul.f32 1.5258789e-05, %v906_v26 }
 0x1f0   : > { %v2368_v4 = vpack.c.bf16 %v982_v3, %v981_v2  ;;  %vm2198_vm2 = vmpackc.low %vm2196_vm1, %vm3349_vm0  ;;  %v859_v47 = vmul.f32 1.5258789e-05, %v843_v39  ;;  %v908_v48 = vcvt.s32.f32 %v2159_v40  ;;  %v860_v51 = vmul.f32 1.5258789e-05, %v844_v43  ;;  %v1389_v2 = vld [vmem:[%s3371_s12 + $0x18] sm:$0xff]  ;;  %v1394_v43 = vld [vmem:[%s3371_s12 + $0x40] sm:$0xff] }
 0x1f1   : > { %v2570_v8 = vpop.eup %2569  ;;  %2579 = vrcp.f32 %v762_v1  ;;  %2200 = vmatmul.mubr.msk.bf16.gmra.mrb[16].mxu1 %vm2198_vm2, %v2199_v62  ;;  %v923_v52 = vmul.f32 1.5258789e-05, %v907_v44  ;;  %v1386_v62 = vld [vmem:[%s3371_s12] sm:$0xff]  ;;  %v1388_v1 = vld [vmem:[%s3371_s12 + $0x10] sm:$0xff]  ;;  %v2249_v9 = vshrl.u32 %v1387_v0, 16  ;;  %v3396_v44 = vld [vmem:[%s3371_s12 + $0x48] sm:$0xff] }
 0x1f2   : > { %2388 = vst [vmem:[%s3293_s15 + $0x20] sm:$0xff] %v2368_v4   ;;  %1163 = vmatprep.mubr.bf16.mxu1 %v2947_v32  ;;  %vm935_vm3 = vcmp.gt.f32.partialorder %v2570_v8, %v855_v63  ;;  %v924_v54 = vmul.f32 1.5258789e-05, %v908_v48  ;;  %v1418_v3 = vand.u32 65535, %v1386_v62  ;;  %v2248_v4 = vshrl.u32 %v1386_v62, 16  ;;  %v3427_v62 = vld [vmem:[%s3371_s12 + $0x68] sm:$0xff] }
 0x1f3   : > { %v2572_v13 = vpop.eup %2571  ;;  %v951_v14 = vsel %vm935_vm3, 1.0, %v2570_v8  ;;  %v1420_v10 = vand.u32 65535, %v1388_v1  ;;  %v2250_v15 = vshrl.u32 %v1388_v1, 16  ;;  %v2254_v48 = vshrl.u32 %v1392_v12, 16 }
 0x1f4   : > { %v2574_v16 = vpop.eup %2573  ;;  %vm936_vm4 = vcmp.gt.f32.partialorder %v2572_v13, %v856_v5  ;;  %vm967_vm5 = vcmp.le.f32.partialorder %v951_v14, %v919_v6  ;;  %v1419_v5 = vand.u32 65535, %v1387_v0  ;;  %v1390_v6 = vld [vmem:[%s3371_s12 + $0x20] sm:$0xff]  ;;  %v1450_v17 = vcvt.s32.f32 %v1418_v3  ;;  %v3433_v3 = vld [vmem:[%s3371_s12 + $0x70] sm:$0xff] }
 0x1f5   : > { %v763_v18 = vadd.f32 1.0, %v2574_v16  ;;  %v952_v19 = vsel %vm936_vm4, 1.0, %v2572_v13  ;;  %vm3359_vm7 = vmneg %vm967_vm5  ;;  %v983_v29 = vsel %vm967_vm5, 0.0, %v951_v14  ;;  %v1069_v13 = vld [vmem:[%s3771_s3] sm:$0x3]  ;;  %v2251_v16 = vshrl.u32 %v1389_v2, 16 }
 0x1f6   : > { %v2576_v23 = vpop.eup %2575  ;;  %vm968_vm6 = vcmp.le.f32.partialorder %v952_v19, %v920_v11  ;;  %v2204_v25 = vpack.c.bf16 %v952_v19, %v951_v14  ;;  %v1421_v11 = vand.u32 65535, %v1389_v2  ;;  %v2252_v22 = vshrl.u32 %v1390_v6, 16 }
 0x1f7   : > { %2581 = vrcp.f32 %v763_v18  ;;  %v764_v28 = vadd.f32 1.0, %v2576_v23  ;;  %v984_v30 = vsel %vm968_vm6, 0.0, %v952_v19  ;;  %vm2201_vm8 = vmneg %vm968_vm6  ;;  %v1578_v18 = vcvt.s32.f32 %v2248_v4 }
 0x1f8   : > { %v2373_v31 = vpack.c.bf16 %v984_v30, %v983_v29  ;;  %vm2203_vm9 = vmpackc.low %vm2201_vm8, %vm3359_vm7  ;;  %v1422_v19 = vand.u32 65535, %v1390_v6  ;;  %v1424_v23 = vand.u32 65535, %v1392_v12  ;;  %v1452_v26 = vcvt.s32.f32 %v1420_v10 }
 0x1f9   : > { %v2578_v37 = vpop.eup %2577  ;;  %2583 = vrcp.f32 %v764_v28  ;;  %2205 = vmatmul.mubr.msk.bf16.gmra.mrb[20].mxu1 %vm2203_vm9, %v2204_v25  ;;  %v1579_v25 = vcvt.s32.f32 %v2249_v9  ;;  %v1453_v27 = vcvt.s32.f32 %v1421_v11  ;;  %v1393_v28 = vld [vmem:[%s3371_s12 + $0x38] sm:$0xff]  ;;  %v1580_v30 = vcvt.s32.f32 %v2250_v15 }
 0x1fa   : > { %2389 = vst [vmem:[%s3293_s15 + $0x28] sm:$0xff] %v2373_v31   ;;  %1173 = vmatprep.mubr.bf16.mxu1 %v2947_v32  ;;  %vm937_vm10 = vcmp.gt.f32.partialorder %v2578_v37, %v857_v20  ;;  %v1423_v20 = vand.u32 65535, %v1391_v7  ;;  %v1581_v31 = vcvt.s32.f32 %v2251_v16  ;;  %v3388_v35 = vmul.f32 1.5258789e-05, %v1450_v17 }
 0x1fb   : > { %v2580_v41 = vpop.eup %2579  ;;  %v953_v42 = vsel %vm937_vm10, 1.0, %v2578_v37  ;;  %v3390_v36 = vmul.f32 1.5258789e-05, %v1578_v18  ;;  %v1454_v37 = vcvt.s32.f32 %v1422_v19  ;;  %v1582_v40 = vcvt.s32.f32 %v2252_v22 }
 0x1fc   : > { %vm938_vm11 = vcmp.gt.f32.partialorder %v2580_v41, %v858_v21  ;;  %vm969_vm12 = vcmp.le.f32.partialorder %v953_v42, %v921_v34  ;;  %v1451_v21 = vcvt.s32.f32 %v1419_v5  ;;  %v2253_v34 = vshrl.u32 %v1391_v7, 16 }
 0x1fd   : > { %v954_v45 = vsel %vm938_vm11, 1.0, %v2580_v41  ;;  %vm2207_vm14 = vmneg %vm969_vm12  ;;  %v985_v33 = vsel %vm969_vm12, 0.0, %v953_v42  ;;  %v1456_v41 = vcvt.s32.f32 %v1424_v23  ;;  %v2257_v0 = vshrl.u32 %v3396_v44, 16 }
 0x1fe   : > { %vm970_vm13 = vcmp.le.f32.partialorder %v954_v45, %v922_v38  ;;  %v2209_v46 = vpack.c.bf16 %v954_v45, %v953_v42  ;;  %v1455_v38 = vcvt.s32.f32 %v1423_v20  ;;  %v3392_v39 = vmul.f32 1.5258789e-05, %v1451_v21 }
 0x1ff   : > { %v986_v49 = vsel %vm970_vm13, 0.0, %v954_v45  ;;  %vm2206_vm15 = vmneg %vm970_vm13  ;;  %v1425_v42 = vand.u32 65535, %v1393_v28  ;;  %v3398_v45 = vmul.f32 1.5258789e-05, %v1579_v25  ;;  %v1431_v11 = vand.u32 65535, %v3427_v62 }
 0x200   : > { %v2378_v50 = vpack.c.bf16 %v986_v49, %v985_v33  ;;  %vm2208_vm0 = vmpackc.low %vm2206_vm15, %vm2207_vm14  ;;  %v3404_v33 = vmul.f32 1.5258789e-05, %v1580_v30  ;;  %v3406_v49 = vmul.f32 1.5258789e-05, %v1581_v31  ;;  %v1432_v15 = vand.u32 65535, %v3433_v3 }
 0x201   : > { %v2582_v53 = vpop.eup %2581  ;;  %2210 = vmatmul.mubr.msk.bf16.gmra.mrb[24].mxu1 %vm2208_vm0, %v2209_v46  ;;  %v3400_v46 = vmul.f32 1.5258789e-05, %v1452_v26 }
 0x202   : > { %2390 = vst [vmem:[%s3293_s15 + $0x30] sm:$0xff] %v2378_v50   ;;  %1183 = vmatprep.mubr.bf16.mxu1 %v2947_v32  ;;  %vm939_vm1 = vcmp.gt.f32.partialorder %v2582_v53, %v859_v47  ;;  %v1071_v32 = vlaneseq  ;;  %v3402_v47 = vmul.f32 1.5258789e-05, %v1453_v27  ;;  %v1583_v50 = vcvt.s32.f32 %v2253_v34 }
 0x203   : > { %v2584_v55 = vpop.eup %2583  ;;  %v955_v56 = vsel %vm939_vm1, 1.0, %v2582_v53  ;;  %v3412_v53 = vld [vmem:[%s3371_s12 + $0x58] sm:$0xff] }
 0x204   : > { %vm940_vm2 = vcmp.gt.f32.partialorder %v2584_v55, %v860_v51  ;;  %vm971_vm3 = vcmp.le.f32.partialorder %v955_v56, %v923_v52  ;;  %v1072_v63 = vshrl.u32 %v1071_v32, 7  ;;  %v2255_v51 = vshrl.u32 %v1393_v28, 16  ;;  %v3409_v52 = vld [vmem:[%s3371_s12 + $0x50] sm:$0xff]  ;;  %v3424_v32 = vld [vmem:[%s3371_s12 + $0x60] sm:$0xff] }
 0x205   : > { %v956_v57 = vsel %vm940_vm2, 1.0, %v2584_v55  ;;  %vm2212_vm5 = vmneg %vm971_vm3  ;;  %v987_v59 = vsel %vm971_vm3, 0.0, %v955_v56  ;;  %v3416_v55 = vmul.f32 1.5258789e-05, %v1455_v38  ;;  %v1428_v1 = vand.u32 65535, %v3409_v52 }
 0x206   : > { %vm972_vm4 = vcmp.le.f32.partialorder %v956_v57, %v924_v54  ;;  %v2214_v58 = vpack.c.bf16 %v956_v57, %v955_v56  ;;  %v1073_v8 = vsub.s32 0, %v1072_v63  ;;  %v1077_v14 = vsub.s32 1, %v1072_v63 }
 0x207   : > { %v988_v60 = vsel %vm972_vm4, 0.0, %v956_v57  ;;  %vm2211_vm6 = vmneg %vm972_vm4  ;;  %v3414_v54 = vmul.f32 1.5258789e-05, %v1454_v37  ;;  %v1426_v56 = vand.u32 65535, %v1394_v43  ;;  %v1427_v57 = vand.u32 65535, %v3396_v44 }
 0x208   : > { %v2383_v61 = vpack.c.bf16 %v988_v60, %v987_v59  ;;  %vm2213_vm7 = vmpackc.low %vm2211_vm6, %vm2212_vm5  ;;  %v3383_v24 = vrot.slane %v1069_v13, %v1073_v8  ;;  %v3386_v29 = vrot.slane %v1069_v13, %v1077_v14  ;;  %v3421_v59 = vmul.f32 1.5258789e-05, %v1456_v41 }
 0x209   : > { %2215 = vmatmul.mubr.msk.bf16.gmra.mrb[28].mxu1 %vm2213_vm7, %v2214_v58  ;;  %v3419_v58 = vmul.f32 1.5258789e-05, %v1582_v40  ;;  %v1457_v60 = vcvt.s32.f32 %v1425_v42  ;;  %v1584_v63 = vcvt.s32.f32 %v2254_v48  ;;  %v1429_v2 = vand.u32 65535, %v3412_v53 }
 0x20a   : > { %2391 = vst [vmem:[%s3293_s15 + $0x38] sm:$0xff] %v2383_v61   ;;  %v2256_v61 = vshrl.u32 %v1394_v43, 16  ;;  %v3437_v4 = vmul.f32 1.5258789e-05, %v1583_v50  ;;  %v1585_v5 = vcvt.s32.f32 %v2255_v51  ;;  %v2258_v6 = vshrl.u32 %v3409_v52, 16 }
 0x20b   : > { %v2259_v7 = vshrl.u32 %v3412_v53, 16  ;;  %v1458_v8 = vcvt.s32.f32 %v1426_v56  ;;  %v1459_v9 = vcvt.s32.f32 %v1427_v57  ;;  %v1430_v10 = vand.u32 65535, %v3424_v32 }
 0x20c   : > { %v1586_v12 = vcvt.s32.f32 %v2256_v61  ;;  %v2260_v13 = vshrl.u32 %v3424_v32, 16  ;;  %v2261_v14 = vshrl.u32 %v3427_v62, 16 }
 0x20d   : > { %2844 = shalt.err (!%p2841_p8)
}
 0x20e   : > { %s2845_s14 = scalar_lea.hbm %s3444_s11, 1024  ;;  %s2849_s17 = scalar_lea.hbm %s3775_s7, 4096 }
 0x20f   : > { %p2846_p7 = scmp.ne.s32.totalorder %s3444_s11, %s2845_s14  ;;  %p2850_p11 = scmp.lt.u32.totalorder %s3444_s11, %s3775_s7 }
 0x210   : > { %p2851_p13 = scmp.lt.u32.totalorder %s2849_s17, %s2845_s14  ;;  %p2853_p4 = scmp.lt.u32.totalorder %s2845_s14, %s3444_s11 }
 0x211   : > { %p2847_p5 = pnand %p2846_p7, %p3824_p6 }
 0x212   : > { %p2852_p3 = por %p2851_p13, %p2850_p11 }
 0x213   : > { %p2848_p0 = pneg %p2847_p5 }
 0x214   : > { %p2854_p12 = por %p2853_p4, %p2852_p3 }
 0x216   : > { %p2855_p10 = pnand %p2854_p12, %p2848_p0 }
 0x218   : > { %2858 = shalt.err (!%p2855_p10)
}
 0x219   : > { %s2949_s10 = smov 64   ;;  %s2950_s28 = smov 4   ;;  %v3477_v16 = vmul.f32 1.5258789e-05, %v1457_v60  ;;  %v1587_v17 = vcvt.s32.f32 %v2257_v0  ;;  %v1460_v18 = vcvt.s32.f32 %v1428_v1  ;;  %v1461_v19 = vcvt.s32.f32 %v1429_v2  ;;  %v1401_v30 = vld [vmem:[%s3371_s12 + $0x78] sm:$0xff]  ;;  %v1402_v40 = vld [vmem:[%s3371_s12 + $0x80] sm:$0xff]  ;;  %v1403_v41 = vld [vmem:[%s3371_s12 + $0x88] sm:$0xff] }
 0x21a   : > { %2403 = dma.vmem_to_hbm [thread:$0]  (%p3824_p6), %s3446_s26, 1024, %s3444_s11, %s1888_s29, %s2949_s10, %s2949_s10, %s2950_s28   ;;  %v3479_v20 = vmul.f32 1.5258789e-05, %v1584_v63  ;;  %v3481_v21 = vmul.f32 1.5258789e-05, %v1585_v5  ;;  %v1588_v22 = vcvt.s32.f32 %v2258_v6  ;;  %v1589_v23 = vcvt.s32.f32 %v2259_v7 }
 0x21b   : > { %v3483_v25 = vmul.f32 1.5258789e-05, %v1458_v8  ;;  %v3485_v26 = vmul.f32 1.5258789e-05, %v1459_v9  ;;  %v1462_v27 = vcvt.s32.f32 %v1430_v10  ;;  %v1463_v28 = vcvt.s32.f32 %v1431_v11  ;;  %v1404_v56 = vld [vmem:[%s3371_s12 + $0x90] sm:$0xff]  ;;  %v1405_v62 = vld [vmem:[%s3371_s12 + $0x98] sm:$0xff]  ;;  %s3597_s26 = scalar_lea.vmem [#allocation9], %s3215_s0  ;;  %s2343_s0 = sshll.u32 %s3120_s8, 11 }
 0x21c   : > { %v3488_v31 = vmul.f32 1.5258789e-05, %v1586_v12  ;;  %v1590_v34 = vcvt.s32.f32 %v2260_v13  ;;  %v1591_v37 = vcvt.s32.f32 %v2261_v14  ;;  %v1464_v38 = vcvt.s32.f32 %v1432_v15  ;;  %s3722_s29 = scalar_lea.hbm %s3774_s6, %s2343_s0  ;;  %s1883_s19 = scalar_lea.sflag [#allocation4], %s3212_s4 }
 0x21d   : > { %v3492_v42 = vmul.f32 1.5258789e-05, %v1587_v17  ;;  %v3494_v43 = vmul.f32 1.5258789e-05, %v1460_v18  ;;  %v3496_v44 = vmul.f32 1.5258789e-05, %v1461_v19  ;;  %v2262_v48 = vshrl.u32 %v3433_v3, 16  ;;  %s2951_s23 = smov [#allocation9]  }
 0x21e   : > { %v3499_v50 = vmul.f32 1.5258789e-05, %v1588_v22  ;;  %v3501_v51 = vmul.f32 1.5258789e-05, %v1589_v23  ;;  %v1433_v52 = vand.u32 65535, %v1401_v30  ;;  %v2263_v53 = vshrl.u32 %v1401_v30, 16  ;;  %s2863_s18 = sshll.u32 %s2951_s23, 4  ;;  %s2864_s18 = int_to_ptr.vmem [resolvable:$false] %s2863_s18 }
 0x21f   : > { %v3504_v57 = vmul.f32 1.5258789e-05, %v1462_v27  ;;  %v3506_v60 = vmul.f32 1.5258789e-05, %v1463_v28  ;;  %v1434_v61 = vand.u32 65535, %v1402_v40  ;;  %v1435_v32 = vand.u32 65535, %v1403_v41  ;;  %s2865_s22 = scalar_lea.vmem %s2864_s18, 4096 }
 0x220   : > { %v3509_v0 = vmul.f32 1.5258789e-05, %v1590_v34  ;;  %v3511_v1 = vmul.f32 1.5258789e-05, %v1591_v37  ;;  %v3513_v2 = vmul.f32 1.5258789e-05, %v1464_v38  ;;  %v2264_v3 = vshrl.u32 %v1402_v40, 16 }
 0x221   : > { %v1592_v7 = vcvt.s32.f32 %v2262_v48  ;;  %v2265_v8 = vshrl.u32 %v1403_v41, 16  ;;  %v1436_v9 = vand.u32 65535, %v1404_v56  ;;  %v1465_v12 = vcvt.s32.f32 %v1433_v52 }
 0x222   : > { %v1593_v13 = vcvt.s32.f32 %v2263_v53  ;;  %v1437_v14 = vand.u32 65535, %v1405_v62  ;;  %v1466_v19 = vcvt.s32.f32 %v1434_v61  ;;  %v1467_v22 = vcvt.s32.f32 %v1435_v32  ;;  %v1406_v32 = vld [vmem:[%s3371_s12 + $0xa0] sm:$0xff] }
 0x223   : > { %v1594_v28 = vcvt.s32.f32 %v2264_v3  ;;  %v2266_v30 = vshrl.u32 %v1404_v56, 16  ;;  %v1595_v37 = vcvt.s32.f32 %v2265_v8  ;;  %v1468_v38 = vcvt.s32.f32 %v1436_v9 }
 0x224   : > { %v1469_v41 = vcvt.s32.f32 %v1437_v14  ;;  %v2267_v48 = vshrl.u32 %v1405_v62, 16  ;;  %v3519_v52 = vmul.f32 1.5258789e-05, %v1592_v7  ;;  %v3521_v53 = vmul.f32 1.5258789e-05, %v1465_v12 }
 0x225   : > { %v3523_v61 = vmul.f32 1.5258789e-05, %v1593_v13  ;;  %v3528_v3 = vmul.f32 1.5258789e-05, %v1467_v22  ;;  %v3532_v9 = vmul.f32 1.5258789e-05, %v1594_v28  ;;  %v3534_v7 = vmul.f32 1.5258789e-05, %v1595_v37 }
 0x226   : > { %v3540_v14 = vmul.f32 1.5258789e-05, %v1469_v41 }
 0x227   : > { %3825 = vst [vmem:[#allocation20_spill] sm:$0xff] %v3534_v7 }
 0x228   : > { %3827 = vst [vmem:[#allocation22_spill] sm:$0xff] %v3540_v14 }
 0x2a4   : > { %v1115_v63 = vpop.f32.mrb[0].mxu1 }
 0x2a5   : > { %v1116_v5 = vadd.f32 %v1115_v63, %v3383_v24  ;;  %v1117_v6 = vpop.f32.mrb[1].mxu1  ;;  %v3526_v63 = vmul.f32 1.5258789e-05, %v1466_v19 }
 0x2a6   : > { %v1118_v10 = vadd.f32 %v1117_v6, %v3386_v29  ;;  %v1119_v11 = vpop.f32.mrb[2].mxu1  ;;  %v1407_v6 = vld [vmem:[%s3371_s12 + $0xa8] sm:$0xff] }
 0x2a7   : > { %v2216_v15 = vmul.f32 -1.442695, %v1116_v5  ;;  %v1120_v17 = vadd.f32 %v1119_v11, %v3383_v24  ;;  %v1121_v18 = vpop.f32.mrb[3].mxu1  ;;  %v1596_v5 = vcvt.s32.f32 %v2266_v30  ;;  %v1408_v11 = vld [vmem:[%s3371_s12 + $0xb0] sm:$0xff]  ;;  %v1439_v28 = vand.u32 65535, %v1407_v6 }
 0x2a8   : > { %v2217_v23 = vmul.f32 -1.442695, %v1118_v10  ;;  %v1122_v27 = vadd.f32 %v1121_v18, %v3386_v29  ;;  %v3536_v10 = vmul.f32 1.5258789e-05, %v1468_v38  ;;  %v1409_v18 = vld [vmem:[%s3371_s12 + $0xb8] sm:$0xff]  ;;  %v1440_v38 = vand.u32 65535, %v1408_v11 }
 0x2a9   : > { %2585 = vpow2.f32 %v2216_v15  ;;  %v2218_v34 = vmul.f32 -1.442695, %v1120_v17  ;;  %v1597_v15 = vcvt.s32.f32 %v2267_v48  ;;  %v1438_v17 = vand.u32 65535, %v1406_v32 }
 0x2aa   : > { %2587 = vpow2.f32 %v2217_v23  ;;  %v2219_v40 = vmul.f32 -1.442695, %v1122_v27  ;;  %3826 = vst [vmem:[#allocation21_spill] sm:$0xff] %v3536_v10  ;;  %v2268_v27 = vshrl.u32 %v1406_v32, 16  ;;  %v3545_v37 = vmul.f32 1.5258789e-05, %v1596_v5 }
 0x2ab   : > { %2589 = vpow2.f32 %v2218_v34  ;;  %v1441_v41 = vand.u32 65535, %v1409_v18  ;;  %v1471_v7 = vcvt.s32.f32 %v1439_v28 }
 0x2ac   : > { %2591 = vpow2.f32 %v2219_v40  ;;  %v1125_v56 = vpop.f32.mrb[4].mxu1  ;;  %3828 = vst [vmem:[#allocation23_spill] sm:$0xff] %v3545_v37  ;;  %v1598_v32 = vcvt.s32.f32 %v2268_v27  ;;  %v2271_v37 = vshrl.u32 %v1409_v18, 16 }
 0x2ad   : > { %v1126_v62 = vadd.f32 %v1125_v56, %v3383_v24  ;;  %v1127_v8 = vpop.f32.mrb[5].mxu1  ;;  %v2269_v56 = vshrl.u32 %v1407_v6, 16 }
 0x2ae   : > { %v1128_v12 = vadd.f32 %v1127_v8, %v3386_v29  ;;  %v1129_v13 = vpop.f32.mrb[6].mxu1  ;;  %v3547_v8 = vmul.f32 1.5258789e-05, %v1597_v15 }
 0x2af   : > { %v2220_v19 = vmul.f32 -1.442695, %v1126_v62  ;;  %v1130_v22 = vadd.f32 %v1129_v13, %v3383_v24  ;;  %v1131_v23 = vpop.f32.mrb[7].mxu1  ;;  %v2270_v62 = vshrl.u32 %v1408_v11, 16  ;;  %v1470_v13 = vcvt.s32.f32 %v1438_v17 }
 0x2b0   : > { %v2221_v30 = vmul.f32 -1.442695, %v1128_v12  ;;  %v1132_v34 = vadd.f32 %v1131_v23, %v3386_v29  ;;  %v1472_v23 = vcvt.s32.f32 %v1440_v38  ;;  %v1599_v15 = vcvt.s32.f32 %v2269_v56 }
 0x2b1   : > { %2593 = vpow2.f32 %v2220_v19  ;;  %v2222_v40 = vmul.f32 -1.442695, %v1130_v22  ;;  %v1600_v28 = vcvt.s32.f32 %v2270_v62 }
 0x2b2   : > { %2595 = vpow2.f32 %v2221_v30  ;;  %v2223_v48 = vmul.f32 -1.442695, %v1132_v34  ;;  %v1473_v34 = vcvt.s32.f32 %v1441_v41  ;;  %v1601_v41 = vcvt.s32.f32 %v2271_v37 }
 0x2b3   : > { %v2586_v14 = vpop.eup %2585  ;;  %2597 = vpow2.f32 %v2222_v40 }
 0x2b4   : > { %v2588_v12 = vpop.eup %2587  ;;  %v1290_v10 = vadd.f32 1.0, %v2586_v14  ;;  %2599 = vpow2.f32 %v2223_v48  ;;  %v1135_v5 = vpop.f32.mrb[8].mxu1  ;;  %v3570_v37 = vmul.f32 1.5258789e-05, %v1473_v34 }
 0x2b5   : > { %v2590_v19 = vpop.eup %2589  ;;  %v1291_v22 = vadd.f32 1.0, %v2588_v12  ;;  %v1136_v6 = vadd.f32 %v1135_v5, %v3383_v24  ;;  %v1137_v30 = vpop.f32.mrb[9].mxu1  ;;  %v3553_v12 = vld [vmem:[%s3371_s12 + $0xc0] sm:$0xff] }
 0x2b6   : > { %v2592_v11 = vpop.eup %2591  ;;  %2601 = vrcp.f32 %v1290_v10  ;;  %v1292_v40 = vadd.f32 1.0, %v2590_v19  ;;  %v1138_v17 = vadd.f32 %v1137_v30, %v3386_v29  ;;  %v1139_v27 = vpop.f32.mrb[10].mxu1  ;;  %v3556_v19 = vmul.f32 1.5258789e-05, %v1470_v13  ;;  %3829 = vst [vmem:[#allocation24_spill] sm:$0xff] %v3570_v37 }
 0x2b7   : > { %2603 = vrcp.f32 %v1291_v22  ;;  %v1293_v14 = vadd.f32 1.0, %v2592_v11  ;;  %v2224_v48 = vmul.f32 -1.442695, %v1136_v6  ;;  %v1140_v18 = vadd.f32 %v1139_v27, %v3383_v24  ;;  %v1141_v38 = vpop.f32.mrb[11].mxu1  ;;  %v3564_v11 = vld [vmem:[%s3371_s12 + $0xc8] sm:$0xff] }
 0x2b8   : > { %2605 = vrcp.f32 %v1292_v40  ;;  %v2225_v5 = vmul.f32 -1.442695, %v1138_v17  ;;  %v1142_v56 = vadd.f32 %v1141_v38, %v3386_v29  ;;  %v3558_v30 = vmul.f32 1.5258789e-05, %v1471_v7 }
 0x2b9   : > { %2607 = vrcp.f32 %v1293_v14  ;;  %v2226_v10 = vmul.f32 -1.442695, %v1140_v18  ;;  %v3560_v22 = vmul.f32 1.5258789e-05, %v1598_v32  ;;  %v1442_v6 = vand.u32 65535, %v3553_v12 }
 0x2ba   : > { %2609 = vpow2.f32 %v2224_v48  ;;  %v2227_v62 = vmul.f32 -1.442695, %v1142_v56  ;;  %v3566_v40 = vmul.f32 1.5258789e-05, %v1599_v15  ;;  %v3568_v17 = vmul.f32 1.5258789e-05, %v1472_v23 }
 0x2bb   : > { %v2594_v27 = vpop.eup %2593  ;;  %2611 = vpow2.f32 %v2225_v5  ;;  %v3572_v48 = vmul.f32 1.5258789e-05, %v1600_v28  ;;  %v3574_v32 = vmul.f32 1.5258789e-05, %v1601_v41  ;;  %v2272_v15 = vshrl.u32 %v3553_v12, 16 }
 0x2bc   : > { %v2596_v13 = vpop.eup %2595  ;;  %v1294_v14 = vadd.f32 1.0, %v2594_v27  ;;  %2613 = vpow2.f32 %v2226_v10  ;;  %v1145_v7 = vpop.f32.mrb[12].mxu1  ;;  %v3579_v10 = vcvt.s32.f32 %v1442_v6 }
 0x2bd   : > { %3830 = vst [vmem:[#allocation25_spill] sm:$0xff] %v3572_v48  ;;  %3831 = vst [vmem:[#allocation26_spill] sm:$0xff] %v3574_v32  ;;  %v2598_v18 = vpop.eup %2597  ;;  %v1295_v38 = vadd.f32 1.0, %v2596_v13  ;;  %2615 = vpow2.f32 %v2227_v62  ;;  %v1146_v56 = vadd.f32 %v1145_v7, %v3383_v24  ;;  %v1147_v5 = vpop.f32.mrb[13].mxu1 }
 0x2be   : > { %v2600_v23 = vpop.eup %2599  ;;  %2617 = vrcp.f32 %v1294_v14  ;;  %v1296_v34 = vadd.f32 1.0, %v2598_v18  ;;  %v1148_v37 = vadd.f32 %v1147_v5, %v3386_v29  ;;  %v1149_v27 = vpop.f32.mrb[14].mxu1 }
 0x2bf   : > { %2619 = vrcp.f32 %v1295_v38  ;;  %v1297_v28 = vadd.f32 1.0, %v2600_v23  ;;  %v2228_v41 = vmul.f32 -1.442695, %v1146_v56  ;;  %v1150_v32 = vadd.f32 %v1149_v27, %v3383_v24  ;;  %v1151_v13 = vpop.f32.mrb[15].mxu1 }
 0x2c0   : > { %v2602_v62 = vpop.eup %2601  ;;  %2621 = vrcp.f32 %v1296_v34  ;;  %v2229_v7 = vmul.f32 -1.442695, %v1148_v37  ;;  %v1152_v48 = vadd.f32 %v1151_v13, %v3386_v29 }
 0x2c1   : > { %v2604_v14 = vpop.eup %2603  ;;  %vm1642_vm8 = vcmp.gt.f32.partialorder %v2602_v62, %v3388_v35  ;;  %2623 = vrcp.f32 %v1297_v28  ;;  %v2230_v18 = vmul.f32 -1.442695, %v1150_v32 }
 0x2c2   : > { %v2606_v38 = vpop.eup %2605  ;;  %v1674_v5 = vsel %vm1642_vm8, 1.0, %v2602_v62  ;;  %vm1643_vm9 = vcmp.gt.f32.partialorder %v2604_v14, %v3392_v39  ;;  %2625 = vpow2.f32 %v2228_v41  ;;  %v3587_v56 = vmul.f32 -1.442695, %v1152_v48 }
 0x2c3   : > { %v2608_v23 = vpop.eup %2607  ;;  %vm1706_vm10 = vcmp.le.f32.partialorder %v1674_v5, %v3390_v36  ;;  %v1675_v37 = vsel %vm1643_vm9, 1.0, %v2604_v14  ;;  %vm1644_vm11 = vcmp.gt.f32.partialorder %v2606_v38, %v3400_v46  ;;  %2627 = vpow2.f32 %v2229_v7 }
 0x2c4   : > { %v2610_v34 = vpop.eup %2609  ;;  %v1738_v35 = vsel %vm1706_vm10, 0.0, %v1674_v5  ;;  %vm1707_vm12 = vcmp.le.f32.partialorder %v1675_v37, %v3398_v45  ;;  %v1676_v32 = vsel %vm1644_vm11, 1.0, %v2606_v38  ;;  %vm1645_vm13 = vcmp.gt.f32.partialorder %v2608_v23, %v3402_v47  ;;  %v1155_v27 = vpop.f32.mrb[16].mxu1 }
 0x2c5   : > { %v2612_v28 = vpop.eup %2611  ;;  %v1739_v39 = vsel %vm1707_vm12, 0.0, %v1675_v37  ;;  %vm1708_vm14 = vcmp.le.f32.partialorder %v1676_v32, %v3404_v33  ;;  %v1677_v48 = vsel %vm1645_vm13, 1.0, %v2608_v23  ;;  %v1298_v41 = vadd.f32 1.0, %v2610_v34  ;;  %v1157_v36 = vpop.f32.mrb[17].mxu1 }
 0x2c6   : > { %v2614_v13 = vpop.eup %2613  ;;  %v2326_v62 = vpack.c.bf16 %v1739_v39, %v1738_v35  ;;  %v1740_v46 = vsel %vm1708_vm14, 0.0, %v1676_v32  ;;  %vm1709_vm15 = vcmp.le.f32.partialorder %v1677_v48, %v3406_v49  ;;  %v1299_v7 = vadd.f32 1.0, %v2612_v28  ;;  %v1159_v14 = vpop.f32.mrb[18].mxu1 }
 0x2c7   : > { %v2616_v45 = vpop.eup %2615  ;;  %v1741_v38 = vsel %vm1709_vm15, 0.0, %v1677_v48  ;;  %2629 = vrcp.f32 %v1298_v41  ;;  %v1300_v47 = vadd.f32 1.0, %v2614_v13  ;;  %v1156_v5 = vadd.f32 %v1155_v27, %v3383_v24  ;;  %v1161_v37 = vpop.f32.mrb[19].mxu1 }
 0x2c8   : > { %v2618_v6 = vpop.eup %2617  ;;  %1866 = vst [vmem:[%s3597_s26] sm:$0xff] %v2326_v62  ;;  %v2327_v33 = vpack.c.bf16 %v1741_v38, %v1740_v46  ;;  %2631 = vrcp.f32 %v1299_v7  ;;  %v1301_v23 = vadd.f32 1.0, %v2616_v45  ;;  %v1158_v49 = vadd.f32 %v1157_v36, %v3386_v29 }
 0x2c9   : > { %v2620_v34 = vpop.eup %2619  ;;  %vm1646_vm0 = vcmp.gt.f32.partialorder %v2618_v6, %v3414_v54  ;;  %2633 = vrcp.f32 %v1300_v47  ;;  %v2232_v35 = vmul.f32 -1.442695, %v1156_v5  ;;  %v1160_v32 = vadd.f32 %v1159_v14, %v3383_v24 }
 0x2ca   : > { %v2622_v27 = vpop.eup %2621  ;;  %1867 = vst [vmem:[%s3597_s26 + $0x8] sm:$0xff] %v2327_v33  ;;  %v1678_v28 = vsel %vm1646_vm0, 1.0, %v2618_v6  ;;  %vm1647_vm1 = vcmp.gt.f32.partialorder %v2620_v34, %v3416_v55  ;;  %2635 = vrcp.f32 %v1301_v23  ;;  %v2233_v39 = vmul.f32 -1.442695, %v1158_v49 }
 0x2cb   : > { %v2624_v48 = vpop.eup %2623  ;;  %vm1710_vm2 = vcmp.le.f32.partialorder %v1678_v28, %v3419_v58  ;;  %v1679_v41 = vsel %vm1647_vm1, 1.0, %v2620_v34  ;;  %vm1648_vm3 = vcmp.gt.f32.partialorder %v2622_v27, %v3421_v59  ;;  %2637 = vpow2.f32 %v2230_v18 }
 0x2cc   : > { %v2626_v36 = vpop.eup %2625  ;;  %v1742_v54 = vsel %vm1710_vm2, 0.0, %v1678_v28  ;;  %vm1711_vm4 = vcmp.le.f32.partialorder %v1679_v41, %v3437_v4  ;;  %v1680_v13 = vsel %vm1648_vm3, 1.0, %v2622_v27  ;;  %vm1649_vm5 = vcmp.gt.f32.partialorder %v2624_v48, %v3477_v16  ;;  %v1165_v62 = vpop.f32.mrb[20].mxu1 }
 0x2cd   : > { %v2628_v6 = vpop.eup %2627  ;;  %v1743_v55 = vsel %vm1711_vm4, 0.0, %v1679_v41  ;;  %vm1712_vm6 = vcmp.le.f32.partialorder %v1680_v13, %v3479_v20  ;;  %v1681_v46 = vsel %vm1649_vm5, 1.0, %v2624_v48  ;;  %v1302_v7 = vadd.f32 1.0, %v2626_v36  ;;  %v1167_v58 = vpop.f32.mrb[21].mxu1 }
 0x2ce   : > { %v2328_v14 = vpack.c.bf16 %v1743_v55, %v1742_v54  ;;  %v1744_v45 = vsel %vm1712_vm6, 0.0, %v1680_v13  ;;  %vm1713_vm7 = vcmp.le.f32.partialorder %v1681_v46, %v3481_v21  ;;  %v1303_v59 = vadd.f32 1.0, %v2628_v6  ;;  %v1169_v18 = vpop.f32.mrb[22].mxu1  ;;  %v3627_v55 = vld [vmem:[%s3371_s12 + $0xd0] sm:$0xff] }
 0x2cf   : > { %v1745_v38 = vsel %vm1713_vm7, 0.0, %v1681_v46  ;;  %2639 = vrcp.f32 %v1302_v7  ;;  %v2234_v4 = vmul.f32 -1.442695, %v1160_v32  ;;  %v1162_v16 = vadd.f32 %v1161_v37, %v3386_v29  ;;  %v1171_v47 = vpop.f32.mrb[23].mxu1 }
 0x2d0   : > { %1868 = vst [vmem:[%s3597_s26 + $0x10] sm:$0xff] %v2328_v14  ;;  %v2329_v5 = vpack.c.bf16 %v1745_v38, %v1744_v45  ;;  %2641 = vrcp.f32 %v1303_v59  ;;  %v1166_v20 = vadd.f32 %v1165_v62, %v3383_v24  ;;  %v1168_v33 = vadd.f32 %v1167_v58, %v3386_v29 }
 0x2d1   : > { %v2630_v23 = vpop.eup %2629  ;;  %2643 = vpow2.f32 %v3587_v56  ;;  %v2235_v21 = vmul.f32 -1.442695, %v1162_v16  ;;  %v1170_v49 = vadd.f32 %v1169_v18, %v3383_v24  ;;  %v1172_v34 = vadd.f32 %v1171_v47, %v3386_v29 }
 0x2d2   : > { %v2632_v27 = vpop.eup %2631  ;;  %1869 = vst [vmem:[%s3597_s26 + $0x18] sm:$0xff] %v2329_v5  ;;  %vm1650_vm8 = vcmp.gt.f32.partialorder %v2630_v23, %v3483_v25  ;;  %2645 = vpow2.f32 %v2232_v35  ;;  %v2236_v37 = vmul.f32 -1.442695, %v1166_v20  ;;  %v2237_v32 = vmul.f32 -1.442695, %v1168_v33 }
 0x2d3   : > { %v2634_v28 = vpop.eup %2633  ;;  %v1682_v48 = vsel %vm1650_vm8, 1.0, %v2630_v23  ;;  %vm1651_vm9 = vcmp.gt.f32.partialorder %v2632_v27, %v3485_v26  ;;  %2647 = vpow2.f32 %v2233_v39  ;;  %v2238_v41 = vmul.f32 -1.442695, %v1170_v49 }
 0x2d4   : > { %v2636_v36 = vpop.eup %2635  ;;  %vm1714_vm10 = vcmp.le.f32.partialorder %v1682_v48, %v3488_v31  ;;  %v1683_v56 = vsel %vm1651_vm9, 1.0, %v2632_v27  ;;  %vm1652_vm11 = vcmp.gt.f32.partialorder %v2634_v28, %v3494_v43  ;;  %2649 = vpow2.f32 %v2234_v4  ;;  %v1175_v54 = vpop.f32.mrb[24].mxu1 }
 0x2d5   : > { %v2638_v13 = vpop.eup %2637  ;;  %v1746_v25 = vsel %vm1714_vm10, 0.0, %v1682_v48  ;;  %vm1715_vm12 = vcmp.le.f32.partialorder %v1683_v56, %v3492_v42  ;;  %v1684_v35 = vsel %vm1652_vm11, 1.0, %v2634_v28  ;;  %vm1653_vm13 = vcmp.gt.f32.partialorder %v2636_v36, %v3496_v44  ;;  %v1177_v62 = vpop.f32.mrb[25].mxu1 }
 0x2d6   : > { %v1747_v26 = vsel %vm1715_vm12, 0.0, %v1683_v56  ;;  %vm1716_vm14 = vcmp.le.f32.partialorder %v1684_v35, %v3499_v50  ;;  %v1685_v39 = vsel %vm1653_vm13, 1.0, %v2636_v36  ;;  %v1304_v31 = vadd.f32 1.0, %v2638_v13  ;;  %v1179_v6 = vpop.f32.mrb[26].mxu1  ;;  %v1413_v36 = vld [vmem:[%s3371_s12 + $0xd8] sm:$0xff] }
 0x2d7   : > { %v2330_v43 = vpack.c.bf16 %v1747_v26, %v1746_v25  ;;  %v1748_v46 = vsel %vm1716_vm14, 0.0, %v1684_v35  ;;  %vm1717_vm15 = vcmp.le.f32.partialorder %v1685_v39, %v3501_v51  ;;  %2651 = vpow2.f32 %v2235_v21  ;;  %v1181_v7 = vpop.f32.mrb[27].mxu1 }
 0x2d8   : > { %v1749_v42 = vsel %vm1717_vm15, 0.0, %v1685_v39  ;;  %2653 = vrcp.f32 %v1304_v31  ;;  %v2239_v44 = vmul.f32 -1.442695, %v1172_v34  ;;  %v1176_v58 = vadd.f32 %v1175_v54, %v3383_v24 }
 0x2d9   : > { %v2640_v14 = vpop.eup %2639  ;;  %1870 = vst [vmem:[%s3597_s26 + $0x20] sm:$0xff] %v2330_v43  ;;  %v2331_v50 = vpack.c.bf16 %v1749_v42, %v1748_v46  ;;  %2655 = vpow2.f32 %v2236_v37  ;;  %v1178_v45 = vadd.f32 %v1177_v62, %v3386_v29  ;;  %v1444_v59 = vand.u32 65535, %v3627_v55 }
 0x2da   : > { %v2642_v18 = vpop.eup %2641  ;;  %vm1654_vm0 = vcmp.gt.f32.partialorder %v2640_v14, %v3504_v57  ;;  %2657 = vpow2.f32 %v2237_v32  ;;  %v2240_v51 = vmul.f32 -1.442695, %v1176_v58  ;;  %v1180_v38 = vadd.f32 %v1179_v6, %v3383_v24 }
 0x2db   : > { %v2644_v4 = vpop.eup %2643  ;;  %1871 = vst [vmem:[%s3597_s26 + $0x28] sm:$0xff] %v2331_v50  ;;  %v1686_v16 = vsel %vm1654_vm0, 1.0, %v2640_v14  ;;  %vm1655_vm1 = vcmp.gt.f32.partialorder %v2642_v18, %v3506_v60  ;;  %2659 = vpow2.f32 %v2238_v41  ;;  %v1182_v47 = vadd.f32 %v1181_v7, %v3386_v29 }
 0x2dc   : > { %v2646_v5 = vpop.eup %2645  ;;  %vm1718_vm2 = vcmp.le.f32.partialorder %v1686_v16, %v3509_v0  ;;  %v1687_v20 = vsel %vm1655_vm1, 1.0, %v2642_v18  ;;  %v1305_v33 = vadd.f32 1.0, %v2644_v4  ;;  %2661 = vpow2.f32 %v2239_v44  ;;  %v1185_v23 = vpop.f32.mrb[28].mxu1 }
 0x2dd   : > { %v2648_v57 = vpop.eup %2647  ;;  %v1750_v21 = vsel %vm1718_vm2, 0.0, %v1686_v16  ;;  %vm1719_vm3 = vcmp.le.f32.partialorder %v1687_v20, %v3511_v1  ;;  %v1306_v49 = vadd.f32 1.0, %v2646_v5  ;;  %2663 = vpow2.f32 %v2240_v51  ;;  %v1187_v34 = vpop.f32.mrb[29].mxu1 }
 0x2de   : > { %v2650_v27 = vpop.eup %2649  ;;  %v1751_v60 = vsel %vm1719_vm3, 0.0, %v1687_v20  ;;  %2665 = vrcp.f32 %v1305_v33  ;;  %v1307_v37 = vadd.f32 1.0, %v2648_v57  ;;  %v2241_v32 = vmul.f32 -1.442695, %v1178_v45  ;;  %v1189_v28 = vpop.f32.mrb[30].mxu1 }
 0x2df   : > { %v2332_v0 = vpack.c.bf16 %v1751_v60, %v1750_v21  ;;  %2667 = vrcp.f32 %v1306_v49  ;;  %v1308_v48 = vadd.f32 1.0, %v2650_v27  ;;  %v2242_v41 = vmul.f32 -1.442695, %v1180_v38  ;;  %v1191_v56 = vpop.f32.mrb[31].mxu1 }
 0x2e0   : > { %2669 = vrcp.f32 %v1307_v37  ;;  %v1186_v54 = vadd.f32 %v1185_v23, %v3383_v24  ;;  %v1188_v1 = vadd.f32 %v1187_v34, %v3386_v29  ;;  %v3645_v13 = vadd.f32 %v1189_v28, %v3383_v24  ;;  %v3834_v37 = vld [vmem:[#allocation21_spill] sm:$0xff] }
 0x2e1   : > { %v2652_v25 = vpop.eup %2651  ;;  %1872 = vst [vmem:[%s3597_s26 + $0x30] sm:$0xff] %v2332_v0  ;;  %2671 = vrcp.f32 %v1308_v48  ;;  %v3832_v35 = vand.u32 65535, %v3564_v11  ;;  %v2243_v26 = vmul.f32 -1.442695, %v1182_v47  ;;  %v3651_v39 = vadd.f32 %v1191_v56, %v3386_v29 }
 0x2e2   : > { %v2654_v31 = vpop.eup %2653  ;;  %v1309_v6 = vadd.f32 1.0, %v2652_v25  ;;  %v3654_v43 = vmul.f32 1.5258789e-05, %v3579_v10  ;;  %2673 = vpow2.f32 %v2241_v32  ;;  %v1445_v46 = vand.u32 65535, %v1413_v36 }
 0x2e3   : > { %v1475_v62 = vcvt.s32.f32 %v3832_v35  ;;  %v2656_v7 = vpop.eup %2655  ;;  %vm1656_vm4 = vcmp.gt.f32.partialorder %v2654_v31, %v3513_v2  ;;  %v1602_v24 = vcvt.s32.f32 %v2272_v15  ;;  %v3833_v42 = vshrl.u32 %v3564_v11, 16 }
 0x2e4   : > { %2675 = vpow2.f32 %v2242_v41  ;;  %v2658_v29 = vpop.eup %2657  ;;  %v1688_v58 = vsel %vm1656_vm4, 1.0, %v2654_v31  ;;  %v1310_v14 = vadd.f32 1.0, %v2656_v7  ;;  %v2274_v10 = vshrl.u32 %v3627_v55, 16 }
 0x2e5   : > { %v3661_v44 = vcvt.s32.f32 %v3833_v42  ;;  %2677 = vrcp.f32 %v1309_v6  ;;  %v2660_v50 = vpop.eup %2659  ;;  %v1311_v45 = vadd.f32 1.0, %v2658_v29  ;;  %v3664_v18 = vcvt.s32.f32 %v1444_v59 }
 0x2e6   : > { %2679 = vpow2.f32 %v2243_v26  ;;  %v2275_v2 = vshrl.u32 %v1413_v36, 16  ;;  %v2662_v51 = vpop.eup %2661  ;;  %v1312_v12 = vadd.f32 1.0, %v2660_v50  ;;  %v3666_v15 = vmul.f32 1.5258789e-05, %v1475_v62  ;;  %v3836_v36 = vld [vmem:[#allocation23_spill] sm:$0xff] }
 0x2e7   : > { %2681 = vrcp.f32 %v1310_v14  ;;  %v3668_v11 = vcvt.s32.f32 %v1445_v46  ;;  %v2664_v38 = vpop.eup %2663  ;;  %vm1720_vm5 = vcmp.le.f32.partialorder %v1688_v58, %v3519_v52  ;;  %v1313_v4 = vadd.f32 1.0, %v2662_v51  ;;  %v3838_v14 = vld [vmem:[#allocation24_spill] sm:$0xff]  ;;  %v3840_v51 = vld [vmem:[#allocation26_spill] sm:$0xff] }
 0x2e8   : > { %2683 = vrcp.f32 %v1311_v45  ;;  %v2244_v16 = vmul.f32 -1.442695, %v1186_v54  ;;  %v2666_v55 = vpop.eup %2665  ;;  %v1314_v47 = vadd.f32 1.0, %v2664_v38  ;;  %v3671_v59 = vmul.f32 1.5258789e-05, %v1602_v24  ;;  %v3839_v45 = vld [vmem:[#allocation25_spill] sm:$0xff] }
 0x2e9   : > { %2685 = vrcp.f32 %v1312_v12  ;;  %v3673_v5 = vcvt.s32.f32 %v2274_v10  ;;  %v2668_v20 = vpop.eup %2667  ;;  %vm1657_vm6 = vcmp.gt.f32.partialorder %v2666_v55, %v3521_v53  ;;  %v3676_v33 = vcvt.s32.f32 %v2275_v2  ;;  %v1414_v10 = vld [vmem:[%s3371_s12 + $0xe0] sm:$0xff] }
 0x2ea   : > { %2687 = vrcp.f32 %v1313_v4  ;;  %v2245_v23 = vmul.f32 -1.442695, %v1188_v1  ;;  %v2670_v57 = vpop.eup %2669  ;;  %v1752_v21 = vsel %vm1720_vm5, 0.0, %v1688_v58  ;;  %v1689_v52 = vsel %vm1657_vm6, 1.0, %v2666_v55 }
 0x2eb   : > { %vm1658_vm7 = vcmp.gt.f32.partialorder %v2668_v20, %v3526_v63  ;;  %2689 = vrcp.f32 %v1314_v47  ;;  %v2672_v49 = vpop.eup %2671  ;;  %vm1721_vm8 = vcmp.le.f32.partialorder %v1689_v52, %v3523_v61  ;;  %vm1659_vm9 = vcmp.gt.f32.partialorder %v2670_v57, %v3528_v3  ;;  %v3835_v63 = vld [vmem:[#allocation20_spill] sm:$0xff]  ;;  %v1415_v47 = vld [vmem:[%s3371_s12 + $0xe8] sm:$0xff] }
 0x2ec   : > { %v1690_v34 = vsel %vm1658_vm7, 1.0, %v2668_v20  ;;  %2691 = vpow2.f32 %v2244_v16  ;;  %v2674_v27 = vpop.eup %2673  ;;  %v1753_v53 = vsel %vm1721_vm8, 0.0, %v1689_v52  ;;  %v1691_v60 = vsel %vm1659_vm9, 1.0, %v2670_v57 }
 0x2ed   : > { %vm1722_vm10 = vcmp.le.f32.partialorder %v1690_v34, %v3532_v9  ;;  %vm1660_vm11 = vcmp.gt.f32.partialorder %v2672_v49, %v3834_v37  ;;  %v2333_v28 = vpack.c.bf16 %v1753_v53, %v1752_v21  ;;  %vm1723_vm12 = vcmp.le.f32.partialorder %v1691_v60, %v3835_v63  ;;  %v3837_v9 = vld [vmem:[#allocation22_spill] sm:$0xff] }
 0x2ee   : > { %v2676_v32 = vpop.eup %2675  ;;  %v1754_v0 = vsel %vm1722_vm10, 0.0, %v1690_v34  ;;  %v1692_v48 = vsel %vm1660_vm11, 1.0, %v2672_v49  ;;  %v1755_v61 = vsel %vm1723_vm12, 0.0, %v1691_v60  ;;  %v1315_v3 = vadd.f32 1.0, %v2674_v27 }
 0x2ef   : > { %v2678_v41 = vpop.eup %2677  ;;  %vm1724_vm13 = vcmp.le.f32.partialorder %v1692_v48, %v3836_v36  ;;  %v1316_v56 = vadd.f32 1.0, %v2676_v32  ;;  %1873 = vst [vmem:[%s3597_s26 + $0x38] sm:$0xff] %v2333_v28  ;;  %v2334_v1 = vpack.c.bf16 %v1755_v61, %v1754_v0  ;;  %2693 = vpow2.f32 %v2245_v23 }
 0x2f0   : > { %v2680_v54 = vpop.eup %2679  ;;  %vm1661_vm14 = vcmp.gt.f32.partialorder %v2678_v41, %v3837_v9  ;;  %v2246_v25 = vmul.f32 -1.442695, %v3645_v13  ;;  %v1756_v62 = vsel %vm1724_vm13, 0.0, %v1692_v48  ;;  %2695 = vrcp.f32 %v1315_v3 }
 0x2f1   : > { %v2682_v35 = vpop.eup %2681  ;;  %v1693_v26 = vsel %vm1661_vm14, 1.0, %v2678_v41  ;;  %v1317_v31 = vadd.f32 1.0, %v2680_v54  ;;  %1874 = vst [vmem:[%s3597_s26 + $0x40] sm:$0xff] %v2334_v1  ;;  %2697 = vrcp.f32 %v1316_v56  ;;  %v2247_v46 = vmul.f32 -1.442695, %v3651_v39  ;;  %v1416_v41 = vld [vmem:[%s3371_s12 + $0xf0] sm:$0xff] }
 0x2f2   : > { %v2684_v6 = vpop.eup %2683  ;;  %vm1725_vm15 = vcmp.le.f32.partialorder %v1693_v26, %v3547_v8  ;;  %vm1662_vm0 = vcmp.gt.f32.partialorder %v2682_v35, %v3556_v19  ;;  %v1446_v4 = vand.u32 65535, %v1414_v10  ;;  %v1508_v55 = vmul.f32 1.5258789e-05, %v3664_v18  ;;  %v1417_v56 = vld [vmem:[%s3371_s12 + $0xf8] sm:$0xff]  ;;  %s1902_s12 = sshll.u32 %s3597_s26, 4  ;;  %s3724_s12 = int_to_ptr.vmem [resolvable:$true] %s1902_s12 }
 0x2f3   : > { %v2686_v7 = vpop.eup %2685  ;;  %v1757_v24 = vsel %vm1725_vm15, 0.0, %v1693_v26  ;;  %v1694_v42 = vsel %vm1662_vm0, 1.0, %v2682_v35  ;;  %vm1663_vm1 = vcmp.gt.f32.partialorder %v2684_v6, %v3558_v30  ;;  %2699 = vrcp.f32 %v1317_v31  ;;  %s2859_s8 = scalar_lea.vmem %s3724_s12, 2048  ;;  %p2866_p8 = scmp.lt.s32.totalorder %s3724_s12, %s2864_s18 }
 0x2f4   : > { %v2688_v13 = vpop.eup %2687  ;;  %v2335_v29 = vpack.c.bf16 %v1757_v24, %v1756_v62  ;;  %vm1726_vm2 = vcmp.le.f32.partialorder %v1694_v42, %v3560_v22  ;;  %v1695_v58 = vsel %vm1663_vm1, 1.0, %v2684_v6  ;;  %vm1664_vm3 = vcmp.gt.f32.partialorder %v2686_v7, %v3568_v17  ;;  %p2860_p9 = scmp.ne.s32.totalorder %s3724_s12, %s2859_s8  ;;  %p2867_p7 = scmp.lt.s32.totalorder %s2865_s22, %s2859_s8 }
 0x2f5   : > { %v2690_v8 = vpop.eup %2689  ;;  %v1758_v19 = vsel %vm1726_vm2, 0.0, %v1694_v42  ;;  %vm1727_vm4 = vcmp.le.f32.partialorder %v1695_v58, %v3566_v40  ;;  %v1696_v39 = vsel %vm1664_vm3, 1.0, %v2686_v7  ;;  %vm1665_vm5 = vcmp.gt.f32.partialorder %v2688_v13, %v3838_v14 }
 0x2f6   : > { %v2692_v50 = vpop.eup %2691  ;;  %1875 = vst [vmem:[%s3597_s26 + $0x48] sm:$0xff] %v2335_v29  ;;  %v1759_v30 = vsel %vm1727_vm4, 0.0, %v1695_v58  ;;  %vm1728_vm6 = vcmp.le.f32.partialorder %v1696_v39, %v3839_v45  ;;  %v1697_v2 = vsel %vm1665_vm5, 1.0, %v2688_v13  ;;  %vm1666_vm7 = vcmp.gt.f32.partialorder %v2690_v8, %v3654_v43  ;;  %p2861_p1 = pnand %p2860_p9, %p3824_p6  ;;  %p2868_p5 = por %p2867_p7, %p2866_p8 }
 0x2f7   : > { %v2336_v22 = vpack.c.bf16 %v1759_v30, %v1758_v19  ;;  %v1760_v17 = vsel %vm1728_vm6, 0.0, %v1696_v39  ;;  %vm1729_vm8 = vcmp.le.f32.partialorder %v1697_v2, %v3840_v51  ;;  %v1698_v12 = vsel %vm1666_vm7, 1.0, %v2690_v8 }
 0x2f8   : > { %v1761_v40 = vsel %vm1729_vm8, 0.0, %v1697_v2  ;;  %v1318_v38 = vadd.f32 1.0, %v2692_v50  ;;  %2701 = vpow2.f32 %v2246_v25  ;;  %vm1730_vm9 = vcmp.le.f32.partialorder %v1698_v12, %v3671_v59  ;;  %p2862_p2 = pneg %p2861_p1 }
 0x2f9   : > { %1876 = vst [vmem:[%s3597_s26 + $0x50] sm:$0xff] %v2336_v22  ;;  %v2337_v16 = vpack.c.bf16 %v1761_v40, %v1760_v17  ;;  %2703 = vpow2.f32 %v2247_v46  ;;  %v2694_v20 = vpop.eup %2693  ;;  %v1635_v43 = vmul.f32 1.5258789e-05, %v3661_v44  ;;  %v1509_v23 = vmul.f32 1.5258789e-05, %v3668_v11 }
 0x2fa   : > { %2705 = vrcp.f32 %v1318_v38  ;;  %v2696_v57 = vpop.eup %2695  ;;  %v1636_v21 = vmul.f32 1.5258789e-05, %v3673_v5  ;;  %v2276_v52 = vshrl.u32 %v1414_v10, 16  ;;  %v1319_v49 = vadd.f32 1.0, %v2694_v20  ;;  %p2869_p0 = pnand %p2868_p5, %p2862_p2 }
 0x2fb   : > { %1877 = vst [vmem:[%s3597_s26 + $0x58] sm:$0xff] %v2337_v16  ;;  %v2698_v34 = vpop.eup %2697  ;;  %vm1667_vm10 = vcmp.gt.f32.partialorder %v2696_v57, %v3666_v15  ;;  %v1637_v18 = vmul.f32 1.5258789e-05, %v3676_v33  ;;  %v1478_v27 = vcvt.s32.f32 %v1446_v4  ;;  %v1447_v53 = vand.u32 65535, %v1415_v47 }
 0x2fc   : > { %v1762_v59 = vsel %vm1730_vm9, 0.0, %v1698_v12  ;;  %v1699_v37 = vsel %vm1667_vm10, 1.0, %v2696_v57  ;;  %vm1668_vm11 = vcmp.gt.f32.partialorder %v2698_v34, %v1508_v55  ;;  %2707 = vrcp.f32 %v1319_v49 }
 0x2fd   : > { %v2700_v60 = vpop.eup %2699  ;;  %vm1731_vm12 = vcmp.le.f32.partialorder %v1699_v37, %v1635_v43  ;;  %v1700_v44 = vsel %vm1668_vm11, 1.0, %v2698_v34  ;;  %v2277_v11 = vshrl.u32 %v1415_v47, 16  ;;  %v1606_v15 = vcvt.s32.f32 %v2276_v52 }
 0x2fe   : > { %vm1669_vm13 = vcmp.gt.f32.partialorder %v2700_v60, %v1509_v23  ;;  %v1763_v5 = vsel %vm1731_vm12, 0.0, %v1699_v37  ;;  %vm1732_vm14 = vcmp.le.f32.partialorder %v1700_v44, %v1636_v21  ;;  %v1479_v0 = vcvt.s32.f32 %v1447_v53 }
 0x2ff   : > { %v1701_v32 = vsel %vm1669_vm13, 1.0, %v2700_v60  ;;  %v2338_v28 = vpack.c.bf16 %v1763_v5, %v1762_v59  ;;  %v1764_v33 = vsel %vm1732_vm14, 0.0, %v1700_v44  ;;  %v1510_v48 = vmul.f32 1.5258789e-05, %v1478_v27 }
 0x300   : > { %vm1733_vm15 = vcmp.le.f32.partialorder %v1701_v32, %v1637_v18  ;;  %v1607_v3 = vcvt.s32.f32 %v2277_v11  ;;  %v1638_v1 = vmul.f32 1.5258789e-05, %v1606_v15  ;;  %v1511_v35 = vmul.f32 1.5258789e-05, %v1479_v0 }
 0x301   : > { %v1765_v63 = vsel %vm1733_vm15, 0.0, %v1701_v32  ;;  %1878 = vst [vmem:[%s3597_s26 + $0x60] sm:$0xff] %v2338_v28  ;;  %v1448_v62 = vand.u32 65535, %v1416_v41  ;;  %v1449_v31 = vand.u32 65535, %v1417_v56  ;;  %v2278_v7 = vshrl.u32 %v1416_v41, 16 }
 0x302   : > { %v2702_v61 = vpop.eup %2701  ;;  %v2339_v36 = vpack.c.bf16 %v1765_v63, %v1764_v33  ;;  %v1639_v46 = vmul.f32 1.5258789e-05, %v1607_v3  ;;  %v2279_v42 = vshrl.u32 %v1417_v56, 16 }
 0x303   : > { %v2704_v54 = vpop.eup %2703  ;;  %v1320_v9 = vadd.f32 1.0, %v2702_v61  ;;  %v1480_v13 = vcvt.s32.f32 %v1448_v62  ;;  %v1481_v8 = vcvt.s32.f32 %v1449_v31  ;;  %v1608_v19 = vcvt.s32.f32 %v2278_v7 }
 0x304   : > { %v2706_v25 = vpop.eup %2705  ;;  %1879 = vst [vmem:[%s3597_s26 + $0x68] sm:$0xff] %v2339_v36  ;;  %v1321_v26 = vadd.f32 1.0, %v2704_v54  ;;  %v1609_v14 = vcvt.s32.f32 %v2279_v42 }
 0x305   : > { %vm1670_vm0 = vcmp.gt.f32.partialorder %v2706_v25, %v1510_v48  ;;  %2709 = vrcp.f32 %v1320_v9  ;;  %v1512_v50 = vmul.f32 1.5258789e-05, %v1480_v13  ;;  %v1513_v30 = vmul.f32 1.5258789e-05, %v1481_v8 }
 0x306   : > { %v1702_v6 = vsel %vm1670_vm0, 1.0, %v2706_v25  ;;  %2711 = vrcp.f32 %v1321_v26  ;;  %v2708_v24 = vpop.eup %2707  ;;  %v1640_v45 = vmul.f32 1.5258789e-05, %v1608_v19  ;;  %v1641_v22 = vmul.f32 1.5258789e-05, %v1609_v14 }
 0x307   : > { %vm1734_vm1 = vcmp.le.f32.partialorder %v1702_v6, %v1638_v1  ;;  %vm1671_vm2 = vcmp.gt.f32.partialorder %v2708_v24, %v1511_v35 }
 0x308   : > { %v1766_v29 = vsel %vm1734_vm1, 0.0, %v1702_v6  ;;  %v1703_v58 = vsel %vm1671_vm2, 1.0, %v2708_v24 }
 0x309   : > { %vm1735_vm3 = vcmp.le.f32.partialorder %v1703_v58, %v1639_v46 }
 0x30a   : > { %v1767_v39 = vsel %vm1735_vm3, 0.0, %v1703_v58 }
 0x30b   : > { %v2340_v10 = vpack.c.bf16 %v1767_v39, %v1766_v29 }
 0x30d   : > { %1880 = vst [vmem:[%s3597_s26 + $0x70] sm:$0xff] %v2340_v10 }
 0x30f   : > { %v2710_v2 = vpop.eup %2709 }
 0x310   : > { %v2712_v17 = vpop.eup %2711  ;;  %vm1672_vm4 = vcmp.gt.f32.partialorder %v2710_v2, %v1512_v50 }
 0x311   : > { %v1704_v51 = vsel %vm1672_vm4, 1.0, %v2710_v2  ;;  %vm1673_vm5 = vcmp.gt.f32.partialorder %v2712_v17, %v1513_v30 }
 0x312   : > { %vm1736_vm6 = vcmp.le.f32.partialorder %v1704_v51, %v1640_v45  ;;  %v1705_v12 = vsel %vm1673_vm5, 1.0, %v2712_v17 }
 0x313   : > { %v1768_v40 = vsel %vm1736_vm6, 0.0, %v1704_v51  ;;  %vm1737_vm7 = vcmp.le.f32.partialorder %v1705_v12, %v1641_v22 }
 0x314   : > { %v1769_v38 = vsel %vm1737_vm7, 0.0, %v1705_v12 }
 0x315   : > { %v2341_v4 = vpack.c.bf16 %v1769_v38, %v1768_v40 }
 0x317   : > { %1881 = vst [vmem:[%s3597_s26 + $0x78] sm:$0xff] %v2341_v4 }
 0x318   : > { %2872 = shalt.err (!%p2869_p0)
}
 0x319   : > { %s2873_s14 = scalar_lea.hbm %s3722_s29, 2048  ;;  %s2877_s17 = scalar_lea.hbm %s3774_s6, 8192 }
 0x31a   : > { %p2874_p11 = scmp.ne.s32.totalorder %s3722_s29, %s2873_s14  ;;  %p2878_p4 = scmp.lt.u32.totalorder %s3722_s29, %s3774_s6 }
 0x31b   : > { %p2879_p12 = scmp.lt.u32.totalorder %s2877_s17, %s2873_s14  ;;  %p2881_p9 = scmp.lt.u32.totalorder %s2873_s14, %s3722_s29 }
 0x31c   : > { %p2875_p13 = pnand %p2874_p11, %p3824_p6 }
 0x31d   : > { %p2880_p10 = por %p2879_p12, %p2878_p4 }
 0x31e   : > { %p2876_p3 = pneg %p2875_p13 }
 0x31f   : > { %p2882_p1 = por %p2881_p9, %p2880_p10 }
 0x321   : > { %p2883_p2 = pnand %p2882_p1, %p2876_p3 }
 0x323   : > { %2886 = shalt.err (!%p2883_p2)
}
 0x324   : > { %s2952_s10 = smov 128   ;;  %s2953_s28 = smov 8  }
 0x325   : > { %2402 = dma.vmem_to_hbm [thread:$0]  (%p3824_p6), %s3724_s12, 2048, %s3722_s29, %s1883_s19, %s2952_s10, %s2952_s10, %s2953_s28  }
 0x326 PF: > { %p2430_p8 = scmp.ge.s32.totalorder %s2937_s27, 2  ;;  %s1933_s26 = sand.u32 1, %s2925_s24  }
 0x327   : > { %p3841_p7 = scmp.ne.s32.totalorder %s3801_s16, 0  ;;  %s1934_s0 = scalar_lea.sflag [#allocation4], %s1933_s26 }
 0x329   : > { %p2421_p5 = pnand %p2430_p8, %p3841_p7 }
 0x32b   : > { %2916 = dma.done.wait (!%p2421_p5), %s1934_s0, 2048  }
 0x32c   : > { %2918 = vsyncadd (!%p2421_p5), %s1934_s0, 4294965248  ;;  %s1943_s13 = scalar_lea.sflag [#allocation11], %s1933_s26 }
 0x32d   : > { %2920 = dma.done.wait (!%p2421_p5), %s1943_s13, 1024  }
 0x32e   : > { %2922 = vsyncadd (!%p2421_p5), %s1943_s13, 4294966272  ;;  %s3842_s27 = sld [smem:[#allocation18_spill]]  ;;  %s3843_s11 = sld [smem:[#allocation17_spill]] }
 0x32f   : > { %s3844_s26 = sld [smem:[#allocation19_spill]]  ;;  %s3845_s24 = smov %s2929_s25 }
 0x334   : > { %p25_p6 = scmp.ge.s32.totalorder %s3842_s27, 6   ;;  %s3846_s25 = smov %s3843_s11 }
 0x336   :  { %27 = sbr.rel (!%p25_p6) target bundleno = 11 (0xb), region = 132 }
 0x33d   :  { %1948 = vsyncpa [#allocation3], 1 }
 0x33e   :  { %1950 = vsyncpa [#allocation3 + $0x1], 1 }
 0x33f   :  { %1951 = vsyncpa [#allocation6], 1 }
 0x340   :  { %1952 = vsyncpa [#allocation4], 1 }
 0x341   :  { %1954 = vsyncpa [#allocation4 + $0x1], 1 }
 0x342   :  { %1955 = vsyncpa [#allocation11], 1 }
 0x343   :  { %1957 = vsyncpa [#allocation11 + $0x1], 1 }

</bundles_post_ra>
